<compile_context>
chip_gen: v6e
topology: v6e:2x2x1
jax: 0.10.0
libtpu: 0.0.40
codegen_flags: <defaults>
</compile_context>

<pallas_src>
import functools

import jax
import jax.numpy as jnp
from jax.experimental import pallas as pl
from jax.experimental.pallas import tpu as pltpu


MATMUL_DTYPE = jnp.bfloat16          # MXU-native operand dtype; f32 accumulation.


def _mm(a, b):
    return jnp.dot(a.astype(MATMUL_DTYPE), b.astype(MATMUL_DTYPE),
                   preferred_element_type=jnp.float32)


def _round_up(x, m):
    return ((x + m - 1) // m) * m


_VMEM_RESIDENT = pl.BlockSpec(memory_space=pltpu.MemorySpace.VMEM)


# --------------------------------------------------------------------------
# Kernel 1: vlln LayerNorm, row-tiled and pipelined over the (B*S, D) slab
# --------------------------------------------------------------------------

def _layernorm_kernel(x_ref, g_ref, b_ref, o_ref):
    x = x_ref[...].astype(jnp.float32)                         # (R, D)
    mean = jnp.mean(x, axis=-1, keepdims=True)
    var = jnp.mean((x - mean) ** 2, axis=-1, keepdims=True)
    y = (x - mean) * jax.lax.rsqrt(var + 1e-5)
    o_ref[...] = (y * g_ref[...] + b_ref[...]).astype(o_ref.dtype)


def layer_norm(x, gamma, beta, *, rows_per_tile=512):
    """nn.LayerNorm over the last dim of (B, S, D)."""
    B, S, D = x.shape
    rows = B * S
    r = min(rows_per_tile, rows)
    y = pl.pallas_call(
        _layernorm_kernel,
        out_shape=jax.ShapeDtypeStruct((rows, D), x.dtype),
        grid=(pl.cdiv(rows, r),),
        in_specs=[pl.BlockSpec((r, D), lambda i: (i, 0)),
                  pl.BlockSpec((1, D), lambda i: (0, 0)),
                  pl.BlockSpec((1, D), lambda i: (0, 0))],
        out_specs=pl.BlockSpec((r, D), lambda i: (i, 0)),
        compiler_params=pltpu.CompilerParams(
            dimension_semantics=("parallel",)),
    )(x.reshape(rows, D), gamma.reshape(1, D), beta.reshape(1, D))
    return y.reshape(B, S, D)


# --------------------------------------------------------------------------
# Kernel 2: fused state encoder + action encoder, writing the concatenated
#           [state | future_tokens | action] slab directly.
# --------------------------------------------------------------------------

def _encoder_kernel(cat_ref, state_ref, noisy_ref, tau_ref,
                    se_w1, se_b1, se_w2, se_b2,
                    ae_w1, ae_b1, ae_w2a, ae_w2b, ae_b2, ae_w3, ae_b3,
                    pos_ref, fut_ref, sa_ref, *, n_state, n_future):
    del cat_ref  # category selection happens in the data-dependent index_maps

    # --- state branch: CategorySpecificMLP  relu(x W1 + b1) W2 + b2 ---
    st = state_ref[...]                                        # (Ts, S_dim) f32
    h = jnp.maximum(_mm(st, se_w1[...]) + se_b1[...], 0.0)     # (Ts, H) f32
    state_out = _mm(h, se_w2[...]) + se_b2[...]                # (Ts, E) f32

    # --- action branch: MultiEmbodimentActionEncoder + positional embedding.
    # concat([a_emb, tau], -1) @ W2  ==  a_emb @ W2[:E] + tau @ W2[E:]
    a_emb = _mm(noisy_ref[...], ae_w1[...]) + ae_b1[...]       # (T, E)
    tau_proj = _mm(tau_ref[...], ae_w2b[...])                  # (1, E) broadcast
    h2 = _mm(a_emb, ae_w2a[...]) + tau_proj + ae_b2[...]
    h2 = h2 * jax.nn.sigmoid(h2)                               # swish (f32)
    act_out = _mm(h2, ae_w3[...]) + ae_b3[...] + pos_ref[...]  # (T, E)

    # --- write the concatenated slab directly (no XLA concat) ---
    sa_ref[:n_state, :] = state_out.astype(sa_ref.dtype)
    sa_ref[n_state:n_state + n_future, :] = fut_ref[...].astype(sa_ref.dtype)
    sa_ref[n_state + n_future:, :] = act_out.astype(sa_ref.dtype)


def fused_encoder(state, noisy, tau, cat_ids,
                  se_W1, se_b1, se_W2, se_b2,
                  ae_W1, ae_b1, ae_W2a, ae_W2b, ae_b2, ae_W3, ae_b3,
                  pos_emb_t, future_tokens):
    B, Ts, S_dim = state.shape
    _, T, A = noisy.shape
    C, _, H = se_W1.shape
    E = se_W2.shape[-1]
    F = future_tokens.shape[0]
    S_total = Ts + F + T

    def cat_block(k, n):   # one category's weight block, selected by prefetch
        return pl.BlockSpec((pl.Squeezed(), k, n),
                            lambda b, cat: (cat[b], 0, 0))

    def batch_block(r, d):
        return pl.BlockSpec((pl.Squeezed(), r, d), lambda b, cat: (b, 0, 0))

    kernel = functools.partial(_encoder_kernel, n_state=Ts, n_future=F)
    return pl.pallas_call(
        kernel,
        out_shape=jax.ShapeDtypeStruct((B, S_total, E), jnp.float32),
        grid_spec=pltpu.PrefetchScalarGridSpec(
            num_scalar_prefetch=1,
            grid=(B,),
            in_specs=[
                batch_block(Ts, S_dim), batch_block(T, A), batch_block(1, E),
                cat_block(S_dim, H), cat_block(1, H),
                cat_block(H, E), cat_block(1, E),
                cat_block(A, E), cat_block(1, E),
                cat_block(E, E), cat_block(E, E), cat_block(1, E),
                cat_block(E, E), cat_block(1, E),
                _VMEM_RESIDENT, _VMEM_RESIDENT,
            ],
            out_specs=batch_block(S_total, E),
        ),
        compiler_params=pltpu.CompilerParams(
            dimension_semantics=("parallel",)),
    )(cat_ids, state, noisy, tau,
      se_W1, se_b1.reshape(C, 1, H), se_W2, se_b2.reshape(C, 1, E),
      ae_W1, ae_b1.reshape(C, 1, E), ae_W2a, ae_W2b, ae_b2.reshape(C, 1, E),
      ae_W3, ae_b3.reshape(C, 1, E),
      pos_emb_t, future_tokens)


# --------------------------------------------------------------------------
# Kernel 3: action decoder (last T rows only) + per-sample masked-MSE partials
# --------------------------------------------------------------------------

def _decoder_kernel(cat_ref, x_ref, vel_ref, mask_ref,
                    ad_w1, ad_b1, ad_w2, ad_b2,
                    pred_ref, sse_ref, msum_ref):
    del cat_ref
    x = x_ref[...]                                             # (T, H) f32
    h = jnp.maximum(_mm(x, ad_w1[...]) + ad_b1[...], 0.0)      # (T, H) f32
    pred = _mm(h, ad_w2[...]) + ad_b2[...]                     # (T, A_pad) f32
    pred_ref[...] = pred.astype(pred_ref.dtype)
    # masked-MSE partials (padding lanes have mask == 0)
    d = pred - vel_ref[...]
    m = mask_ref[...]
    sse_ref[...] = jnp.sum(d * d * m, keepdims=True)
    msum_ref[...] = jnp.sum(m, keepdims=True)


def action_decoder_loss(x_last, velocity_p, mask_p,
                        ad_W1, ad_b1, ad_W2p, ad_b2p, cat_ids):
    B, T, Din = x_last.shape
    C, _, H = ad_W1.shape
    A_pad = ad_W2p.shape[-1]

    def cat_block(k, n):
        return pl.BlockSpec((pl.Squeezed(), k, n),
                            lambda b, cat: (cat[b], 0, 0))

    def batch_block(r, d):
        return pl.BlockSpec((pl.Squeezed(), r, d), lambda b, cat: (b, 0, 0))

    pred, sse, msum = pl.pallas_call(
        _decoder_kernel,
        out_shape=(jax.ShapeDtypeStruct((B, T, A_pad), jnp.float32),
                   jax.ShapeDtypeStruct((B, 1, 1), jnp.float32),
                   jax.ShapeDtypeStruct((B, 1, 1), jnp.float32)),
        grid_spec=pltpu.PrefetchScalarGridSpec(
            num_scalar_prefetch=1,
            grid=(B,),
            in_specs=[batch_block(T, Din), batch_block(T, A_pad),
                      batch_block(T, A_pad),
                      cat_block(Din, H), cat_block(1, H),
                      cat_block(H, A_pad), cat_block(1, A_pad)],
            out_specs=(batch_block(T, A_pad),
                       batch_block(1, 1), batch_block(1, 1)),
        ),
        compiler_params=pltpu.CompilerParams(
            dimension_semantics=("parallel",)),
    )(cat_ids, x_last, velocity_p, mask_p,
      ad_W1, ad_b1.reshape(C, 1, H), ad_W2p, ad_b2p.reshape(C, 1, A_pad))
    return pred, jnp.sum(sse), jnp.sum(msum)


# --------------------------------------------------------------------------
# Glue (plain JAX): sinusoidal encoding, parameter init, module assembly
# --------------------------------------------------------------------------

def sinusoidal_pos_encoding(pos, dim):
    """Interleaved sin/cos encoding of integer positions -> pos.shape + (dim,).
    (SinusoidalPositionalEncoding source not provided; canonical form used.)"""
    half = dim // 2
    freqs = jnp.exp(-jnp.log(10000.0) *
                    jnp.arange(half, dtype=jnp.float32) / half)
    ang = pos[..., None].astype(jnp.float32) * freqs
    pe = jnp.stack([jnp.sin(ang), jnp.cos(ang)], axis=-1)
    return pe.reshape(pos.shape + (dim,))


def init_params(key, cfg):
    C = cfg["max_num_embodiments"]
    H = cfg["hidden_size"]
    E = cfg["input_embedding_dim"]
    D_bb = cfg["backbone_embedding_dim"]
    S_dim = cfg["max_state_dim"]
    A = cfg["action_dim"]

    keys = jax.random.split(key, 16)
    n = lambda k, shape: 0.02 * jax.random.normal(k, shape, dtype=jnp.float32)
    z = lambda shape: jnp.zeros(shape, dtype=jnp.float32)

    return {
        "vlln_g": jnp.ones((D_bb,), jnp.float32),
        "vlln_b": z((D_bb,)),
        # state_encoder: CategorySpecificMLP (S_dim -> H -> E)
        "se_W1": n(keys[0], (C, S_dim, H)), "se_b1": z((C, H)),
        "se_W2": n(keys[1], (C, H, E)),     "se_b2": z((C, E)),
        # action_encoder: MultiEmbodimentActionEncoder (hidden = E)
        "ae_W1": n(keys[2], (C, A, E)),     "ae_b1": z((C, E)),
        "ae_W2": n(keys[3], (C, 2 * E, E)), "ae_b2": z((C, E)),
        "ae_W3": n(keys[4], (C, E, E)),     "ae_b3": z((C, E)),
        # action_decoder: CategorySpecificMLP (H -> H -> A)
        "ad_W1": n(keys[5], (C, H, H)), "ad_b1": z((C, H)),
        "ad_W2": n(keys[6], (C, H, A)), "ad_b2": z((C, A)),
        # future tokens + positional embedding
        "future_tokens": n(keys[7], (cfg["num_target_vision_tokens"], E)),
        "pos_emb": n(keys[8], (cfg["max_seq_len"], E)),
    }


def flowmatching_action_head_forward(cfg, params, backbone_features, state,
                                     actions, action_mask, embodiment_id,
                                     noise, t):
    """Equivalent of FlowmatchingActionHead.forward(..., init=True,
    ground_truth_vlm_emb=None)."""
    B, T, A = actions.shape
    E = cfg["input_embedding_dim"]
    A_pad = _round_up(A, 128)

    # process_backbone_output: vlln LayerNorm (tiled Pallas kernel)
    vl_embs = layer_norm(backbone_features, params["vlln_g"], params["vlln_b"])
    # TODO(synk): SelfAttentionTransformer (vl_self_attention) source/config
    # not provided; treated as identity.  init=True branch:
    predicted_vlm_emb = vl_embs

    # Sort the batch by embodiment so consecutive grid steps reuse the same
    # category weight blocks (identical consecutive block indices skip re-DMA)
    # and only one category's weights are VMEM-resident at a time.
    order = jnp.argsort(embodiment_id)
    inv_order = jnp.argsort(order)
    cat_s = embodiment_id[order].astype(jnp.int32)
    state_s = state[order]
    actions_s = actions[order]
    noise_s = noise[order]
    mask_s = action_mask[order].astype(jnp.float32)
    t_s = t[order].astype(jnp.float32)

    # flow-matching mix / velocity / timestep embedding (tiny; left to XLA,
    # fused with the sort gathers above)
    t3 = t_s[:, None, None]
    noisy_s = (1.0 - t3) * noise_s + t3 * actions_s
    velocity_s = actions_s - noise_s
    t_disc = (t_s * cfg["num_timestep_buckets"]).astype(jnp.int32)
    tau_s = sinusoidal_pos_encoding(t_disc[:, None], E).astype(jnp.float32)

    bf = lambda w: w.astype(MATMUL_DTYPE)

    # Fused state+action encoder writes the concatenated slab directly.
    sa_s = fused_encoder(
        state_s, noisy_s, tau_s, cat_s,
        bf(params["se_W1"]), params["se_b1"],
        bf(params["se_W2"]), params["se_b2"],
        bf(params["ae_W1"]), params["ae_b1"],
        bf(params["ae_W2"][:, :E, :]), bf(params["ae_W2"][:, E:, :]),
        params["ae_b2"], bf(params["ae_W3"]), params["ae_b3"],
        params["pos_emb"][:T], params["future_tokens"])

    # TODO(synk): DiT diffusion transformer (self.model) config/source not
    # provided; treated as identity over hidden_states (predicted_vlm_emb
    # would be its cross-attention context).
    model_output = sa_s

    # Decoder only consumes the last T rows -> slice in the wrapper (aligned,
    # less per-step DMA than shipping the full S_total block).
    x_last = model_output[:, -T:, :]

    # Lane-pad loss operands / decoder output weights so the pred store is a
    # dense 128-lane vst; padding lanes carry mask == 0 so the loss is exact.
    pad = A_pad - A
    vel_p = jnp.pad(velocity_s, ((0, 0), (0, 0), (0, pad)))
    mask_p = jnp.pad(mask_s, ((0, 0), (0, 0), (0, pad)))
    ad_W2p = jnp.pad(params["ad_W2"], ((0, 0), (0, 0), (0, pad)))
    ad_b2p = jnp.pad(params["ad_b2"], ((0, 0), (0, pad)))

    pred_p, sse, msum = action_decoder_loss(
        x_last, vel_p, mask_p,
        bf(params["ad_W1"]), params["ad_b1"], bf(ad_W2p), ad_b2p, cat_s)

    pred_actions = pred_p[inv_order][:, :, :A].astype(actions.dtype)
    action_loss = sse / (msum + 1e-8)
    vlm_loss = jnp.float32(0.0)          # init=True, no ground_truth_vlm_emb
    total_loss = action_loss + 0.5 * vlm_loss
    return total_loss, action_loss, vlm_loss, pred_actions, predicted_vlm_emb


# --------------------------------------------------------------------------
# Pure-JAX reference (same bf16-operand / f32-accumulate matmul contract)
# --------------------------------------------------------------------------

def _ref_cs_linear(x, W, b, cat, act="none"):
    y = jnp.einsum("btd,bdh->bth",
                   x.astype(MATMUL_DTYPE), W[cat].astype(MATMUL_DTYPE),
                   preferred_element_type=jnp.float32) + b[cat][:, None, :]
    if act == "relu":
        y = jnp.maximum(y, 0.0)
    elif act == "swish":
        y = y * jax.nn.sigmoid(y)
    return y


def reference_forward(cfg, params, backbone_features, state, actions,
                      action_mask, embodiment_id, noise, t):
    B, T, A = actions.shape
    E = cfg["input_embedding_dim"]
    mean = jnp.mean(backbone_features, -1, keepdims=True)
    var = jnp.mean((backbone_features - mean) ** 2, -1, keepdims=True)
    vl = (backbone_features - mean) * jax.lax.rsqrt(var + 1e-5)
    vl = vl * params["vlln_g"] + params["vlln_b"]

    sf = _ref_cs_linear(
        _ref_cs_linear(state, params["se_W1"], params["se_b1"],
                       embodiment_id, "relu"),
        params["se_W2"], params["se_b2"], embodiment_id)

    t3 = t[:, None, None]
    noisy = (1 - t3) * noise + t3 * actions
    velocity = actions - noise
    t_disc = (t * cfg["num_timestep_buckets"]).astype(jnp.int32)

    a_emb = _ref_cs_linear(noisy, params["ae_W1"], params["ae_b1"],
                           embodiment_id)
    tau = sinusoidal_pos_encoding(jnp.broadcast_to(t_disc[:, None], (B, T)), E)
    x = jnp.concatenate([a_emb, tau], axis=-1)
    x = _ref_cs_linear(x, params["ae_W2"], params["ae_b2"], embodiment_id,
                       "swish")
    af = _ref_cs_linear(x, params["ae_W3"], params["ae_b3"], embodiment_id)
    af = af + params["pos_emb"][None, :T, :]

    ft = jnp.broadcast_to(params["future_tokens"][None],
                          (B, cfg["num_target_vision_tokens"], E))
    sa = jnp.concatenate([sf, ft, af], axis=1)
    pred = _ref_cs_linear(
        _ref_cs_linear(sa, params["ad_W1"], params["ad_b1"], embodiment_id,
                       "relu"),
        params["ad_W2"], params["ad_b2"], embodiment_id)
    pred_actions = pred[:, -T:]
    action_loss = jnp.sum((pred_actions - velocity) ** 2 * action_mask) / (
        jnp.sum(action_mask) + 1e-8)
    return action_loss, pred_actions, vl


# --------------------------------------------------------------------------

if __name__ == "__main__":
    cfg = dict(
        max_num_embodiments=4,
        hidden_size=128,
        input_embedding_dim=128,     # == hidden_size so identity-DiT is coherent
        backbone_embedding_dim=128,
        max_state_dim=64,
        action_dim=32,
        action_horizon=16,
        num_target_vision_tokens=4,
        max_seq_len=32,
        num_timestep_buckets=1000,
        noise_beta_alpha=1.5,
        noise_beta_beta=1.0,
        noise_s=0.999,
    )

    B = 2
    S_vl = 8
    T = cfg["action_horizon"]
    A = cfg["action_dim"]

    root = jax.random.PRNGKey(0)
    k_par, k_bb, k_state, k_act, k_mask, k_emb, k_noise, k_t = \
        jax.random.split(root, 8)

    params = init_params(k_par, cfg)

    backbone_features = jax.random.normal(
        k_bb, (B, S_vl, cfg["backbone_embedding_dim"]), jnp.float32)
    state = jax.random.normal(k_state, (B, 1, cfg["max_state_dim"]),
                              jnp.float32)
    actions = jax.random.normal(k_act, (B, T, A), jnp.float32)
    action_mask = (jax.random.uniform(k_mask, (B, T, A)) > 0.2).astype(
        jnp.float32)
    embodiment_id = jax.random.randint(
        k_emb, (B,), 0, cfg["max_num_embodiments"], dtype=jnp.int32)

    # Flow-matching noise and Beta-distributed time (sample_time)
    noise = jax.random.normal(k_noise, (B, T, A), jnp.float32)
    beta_sample = jax.random.beta(
        k_t, cfg["noise_beta_alpha"], cfg["noise_beta_beta"], (B,),
        dtype=jnp.float32)
    t = (cfg["noise_s"] - beta_sample) / cfg["noise_s"]

    forward = jax.jit(functools.partial(flowmatching_action_head_forward, cfg))
    total_loss, action_loss, vlm_loss, pred_actions, predicted_vlm_emb = \
        forward(params, backbone_features, state, actions, action_mask,
                embodiment_id, noise, t)
    jax.block_until_ready(
        (total_loss, action_loss, pred_actions, predicted_vlm_emb))

    # Sanity check against the pure-JAX reference
    ref_loss, ref_pred, ref_vl = reference_forward(
        cfg, params, backbone_features, state, actions, action_mask,
        embodiment_id, noise, t)

    assert jnp.allclose(predicted_vlm_emb, ref_vl, rtol=1e-4, atol=1e-4), \
        "vlln LayerNorm mismatch vs reference"
    assert jnp.allclose(pred_actions, ref_pred, rtol=5e-3, atol=1e-4), \
        "pred_actions mismatch vs reference"
    assert jnp.allclose(action_loss, ref_loss, rtol=1e-3, atol=1e-5), \
        "action_loss mismatch vs reference"
    assert bool(jnp.isfinite(total_loss)), "non-finite loss"

    print("KERNEL_OK")
</pallas_src>

<mosaic_0001>
module attributes {stable_mosaic.version = 11 : i64} {
  func.func @_decoder_kernel(%arg0: i32, %arg1: memref<2xi32, #tpu.memory_space<smem>>, %arg2: memref<1x16x128xf32, #tpu.memory_space<vmem>>, %arg3: memref<1x16x128xf32, #tpu.memory_space<vmem>>, %arg4: memref<1x16x128xf32, #tpu.memory_space<vmem>>, %arg5: memref<1x128x128xbf16, #tpu.memory_space<vmem>>, %arg6: memref<1x1x128xf32, #tpu.memory_space<vmem>>, %arg7: memref<1x128x128xbf16, #tpu.memory_space<vmem>>, %arg8: memref<1x1x128xf32, #tpu.memory_space<vmem>>, %arg9: memref<1x16x128xf32, #tpu.memory_space<vmem>>, %arg10: memref<1x1x1xf32, #tpu.memory_space<vmem>>, %arg11: memref<1x1x1xf32, #tpu.memory_space<vmem>>) attributes {dimension_semantics = [#tpu.dimension_semantics<parallel>], iteration_bounds = array<i64: 2>, scalar_prefetch = 1 : i64, scratch_operands = 0 : i64, tpu.core_type = #tpu.core_type<tc>, window_params = [{transform_indices = @transform_0, window_bounds = array<i64: 1, 16, 128>}, {transform_indices = @transform_1, window_bounds = array<i64: 1, 16, 128>}, {transform_indices = @transform_2, window_bounds = array<i64: 1, 16, 128>}, {transform_indices = @transform_3, window_bounds = array<i64: 1, 128, 128>}, {transform_indices = @transform_4, window_bounds = array<i64: 1, 1, 128>}, {transform_indices = @transform_5, window_bounds = array<i64: 1, 128, 128>}, {transform_indices = @transform_6, window_bounds = array<i64: 1, 1, 128>}, {transform_indices = @transform_7, window_bounds = array<i64: 1, 16, 128>}, {transform_indices = @transform_8, window_bounds = array<i64: 1, 1, 1>}, {transform_indices = @transform_9, window_bounds = array<i64: 1, 1, 1>}]} {
    %c0 = arith.constant 0 : index
    %c0_0 = arith.constant 0 : index
    %c0_1 = arith.constant 0 : index
    %0 = vector.load %arg2[%c0, %c0_0, %c0_1] : memref<1x16x128xf32, #tpu.memory_space<vmem>>, vector<1x16x128xf32>
    %1 = vector.shape_cast %0 : vector<1x16x128xf32> to vector<16x128xf32>
    %c0_2 = arith.constant 0 : index
    %c0_3 = arith.constant 0 : index
    %c0_4 = arith.constant 0 : index
    %2 = vector.load %arg5[%c0_2, %c0_3, %c0_4] : memref<1x128x128xbf16, #tpu.memory_space<vmem>>, vector<1x128x128xbf16>
    %3 = vector.shape_cast %2 : vector<1x128x128xbf16> to vector<128x128xbf16>
    %4 = arith.truncf %1 : vector<16x128xf32> to vector<16x128xbf16>
    %cst = arith.constant dense<0.000000e+00> : vector<16x128xf32>
    %5 = tpu.matmul %4, %3, %cst {dimension_numbers = #tpu.dot_dimension_numbers<[1], [0], [0], [1], [0, 0, 1, 1], [], []>} : vector<16x128xbf16>, vector<128x128xbf16>, vector<16x128xf32> -> vector<16x128xf32>
    %c0_5 = arith.constant 0 : index
    %c0_6 = arith.constant 0 : index
    %c0_7 = arith.constant 0 : index
    %6 = vector.load %arg6[%c0_5, %c0_6, %c0_7] : memref<1x1x128xf32, #tpu.memory_space<vmem>>, vector<1x1x128xf32>
    %7 = vector.shape_cast %6 : vector<1x1x128xf32> to vector<1x128xf32>
    %8 = vector.broadcast %7 : vector<1x128xf32> to vector<16x128xf32>
    %9 = arith.addf %5, %8 : vector<16x128xf32>
    %cst_8 = arith.constant 0.000000e+00 : f32
    %10 = vector.broadcast %cst_8 : f32 to vector<16x128xf32>
    %11 = arith.maximumf %9, %10 : vector<16x128xf32>
    %c0_9 = arith.constant 0 : index
    %c0_10 = arith.constant 0 : index
    %c0_11 = arith.constant 0 : index
    %12 = vector.load %arg7[%c0_9, %c0_10, %c0_11] : memref<1x128x128xbf16, #tpu.memory_space<vmem>>, vector<1x128x128xbf16>
    %13 = vector.shape_cast %12 : vector<1x128x128xbf16> to vector<128x128xbf16>
    %14 = arith.truncf %11 : vector<16x128xf32> to vector<16x128xbf16>
    %cst_12 = arith.constant dense<0.000000e+00> : vector<16x128xf32>
    %15 = tpu.matmul %14, %13, %cst_12 {dimension_numbers = #tpu.dot_dimension_numbers<[1], [0], [0], [1], [0, 0, 1, 1], [], []>} : vector<16x128xbf16>, vector<128x128xbf16>, vector<16x128xf32> -> vector<16x128xf32>
    %c0_13 = arith.constant 0 : index
    %c0_14 = arith.constant 0 : index
    %c0_15 = arith.constant 0 : index
    %16 = vector.load %arg8[%c0_13, %c0_14, %c0_15] : memref<1x1x128xf32, #tpu.memory_space<vmem>>, vector<1x1x128xf32>
    %17 = vector.shape_cast %16 : vector<1x1x128xf32> to vector<1x128xf32>
    %18 = vector.broadcast %17 : vector<1x128xf32> to vector<16x128xf32>
    %19 = arith.addf %15, %18 : vector<16x128xf32>
    %c0_16 = arith.constant 0 : index
    %c0_17 = arith.constant 0 : index
    %c0_18 = arith.constant 0 : index
    %20 = vector.load %arg9[%c0_16, %c0_17, %c0_18] : memref<1x16x128xf32, #tpu.memory_space<vmem>>, vector<1x16x128xf32>
    %21 = vector.shape_cast %20 : vector<1x16x128xf32> to vector<16x128xf32>
    %22 = vector.shape_cast %19 : vector<16x128xf32> to vector<1x16x128xf32>
    tpu.vector_store %arg9[%c0_16, %c0_17, %c0_18], %22 {strides = array<i32>} : memref<1x16x128xf32, #tpu.memory_space<vmem>>, vector<1x16x128xf32>,
    %c0_19 = arith.constant 0 : index
    %c0_20 = arith.constant 0 : index
    %c0_21 = arith.constant 0 : index
    %23 = vector.load %arg3[%c0_19, %c0_20, %c0_21] : memref<1x16x128xf32, #tpu.memory_space<vmem>>, vector<1x16x128xf32>
    %24 = vector.shape_cast %23 : vector<1x16x128xf32> to vector<16x128xf32>
    %25 = arith.subf %19, %24 : vector<16x128xf32>
    %c0_22 = arith.constant 0 : index
    %c0_23 = arith.constant 0 : index
    %c0_24 = arith.constant 0 : index
    %26 = vector.load %arg4[%c0_22, %c0_23, %c0_24] : memref<1x16x128xf32, #tpu.memory_space<vmem>>, vector<1x16x128xf32>
    %27 = vector.shape_cast %26 : vector<1x16x128xf32> to vector<16x128xf32>
    %28 = arith.mulf %25, %25 : vector<16x128xf32>
    %29 = arith.mulf %28, %27 : vector<16x128xf32>
    %30 = vector.shape_cast %29 : vector<16x128xf32> to vector<1x16x128xf32>
    %cst_25 = arith.constant dense<0.000000e+00> : vector<1xf32>
    %31 = vector.multi_reduction <add>, %30, %cst_25 [1, 2] : vector<1x16x128xf32> to vector<1xf32>
    %32 = vector.shape_cast %31 : vector<1xf32> to vector<1x1x1xf32>
    %33 = vector.extract %32[0, 0, 0] : f32 from vector<1x1x1xf32>
    %34 = vector.broadcast %33 : f32 to vector<1x1xf32>
    %c0_26 = arith.constant 0 : index
    %c0_27 = arith.constant 0 : index
    %c0_28 = arith.constant 0 : index
    %35 = vector.load %arg10[%c0_26, %c0_27, %c0_28] : memref<1x1x1xf32, #tpu.memory_space<vmem>>, vector<1x1x1xf32>
    %36 = vector.shape_cast %35 : vector<1x1x1xf32> to vector<1x1xf32>
    %37 = vector.shape_cast %34 : vector<1x1xf32> to vector<1x1x1xf32>
    tpu.vector_store %arg10[%c0_26, %c0_27, %c0_28], %37 {strides = array<i32>} : memref<1x1x1xf32, #tpu.memory_space<vmem>>, vector<1x1x1xf32>,
    %38 = vector.shape_cast %27 : vector<16x128xf32> to vector<1x16x128xf32>
    %cst_29 = arith.constant dense<0.000000e+00> : vector<1xf32>
    %39 = vector.multi_reduction <add>, %38, %cst_29 [1, 2] : vector<1x16x128xf32> to vector<1xf32>
    %40 = vector.shape_cast %39 : vector<1xf32> to vector<1x1x1xf32>
    %41 = vector.extract %40[0, 0, 0] : f32 from vector<1x1x1xf32>
    %42 = vector.broadcast %41 : f32 to vector<1x1xf32>
    %c0_30 = arith.constant 0 : index
    %c0_31 = arith.constant 0 : index
    %c0_32 = arith.constant 0 : index
    %43 = vector.load %arg11[%c0_30, %c0_31, %c0_32] : memref<1x1x1xf32, #tpu.memory_space<vmem>>, vector<1x1x1xf32>
    %44 = vector.shape_cast %43 : vector<1x1x1xf32> to vector<1x1xf32>
    %45 = vector.shape_cast %42 : vector<1x1xf32> to vector<1x1x1xf32>
    tpu.vector_store %arg11[%c0_30, %c0_31, %c0_32], %45 {strides = array<i32>} : memref<1x1x1xf32, #tpu.memory_space<vmem>>, vector<1x1x1xf32>,
    return
  }
  func.func @transform_0(%arg0: i32, %arg1: memref<2xi32, #tpu.memory_space<smem>>) -> (i32, i32, i32) {
    %c0_i32 = arith.constant 0 : i32
    %c0_i32_0 = arith.constant 0 : i32
    %c0_i32_1 = arith.constant 0 : i32
    return %arg0, %c0_i32, %c0_i32_0 : i32, i32, i32
  }
  func.func @transform_1(%arg0: i32, %arg1: memref<2xi32, #tpu.memory_space<smem>>) -> (i32, i32, i32) {
    %c0_i32 = arith.constant 0 : i32
    %c0_i32_0 = arith.constant 0 : i32
    %c0_i32_1 = arith.constant 0 : i32
    return %arg0, %c0_i32, %c0_i32_0 : i32, i32, i32
  }
  func.func @transform_2(%arg0: i32, %arg1: memref<2xi32, #tpu.memory_space<smem>>) -> (i32, i32, i32) {
    %c0_i32 = arith.constant 0 : i32
    %c0_i32_0 = arith.constant 0 : i32
    %c0_i32_1 = arith.constant 0 : i32
    return %arg0, %c0_i32, %c0_i32_0 : i32, i32, i32
  }
  func.func @transform_3(%arg0: i32, %arg1: memref<2xi32, #tpu.memory_space<smem>>) -> (i32, i32, i32) {
    %0 = arith.index_cast %arg0 : i32 to index
    %1 = memref.load %arg1[%0] : memref<2xi32, #tpu.memory_space<smem>>
    %c0_i32 = arith.constant 0 : i32
    %c0_i32_0 = arith.constant 0 : i32
    %c0_i32_1 = arith.constant 0 : i32
    return %1, %c0_i32, %c0_i32_0 : i32, i32, i32
  }
  func.func @transform_4(%arg0: i32, %arg1: memref<2xi32, #tpu.memory_space<smem>>) -> (i32, i32, i32) {
    %0 = arith.index_cast %arg0 : i32 to index
    %1 = memref.load %arg1[%0] : memref<2xi32, #tpu.memory_space<smem>>
    %c0_i32 = arith.constant 0 : i32
    %c0_i32_0 = arith.constant 0 : i32
    %c0_i32_1 = arith.constant 0 : i32
    return %1, %c0_i32, %c0_i32_0 : i32, i32, i32
  }
  func.func @transform_5(%arg0: i32, %arg1: memref<2xi32, #tpu.memory_space<smem>>) -> (i32, i32, i32) {
    %0 = arith.index_cast %arg0 : i32 to index
    %1 = memref.load %arg1[%0] : memref<2xi32, #tpu.memory_space<smem>>
    %c0_i32 = arith.constant 0 : i32
    %c0_i32_0 = arith.constant 0 : i32
    %c0_i32_1 = arith.constant 0 : i32
    return %1, %c0_i32, %c0_i32_0 : i32, i32, i32
  }
  func.func @transform_6(%arg0: i32, %arg1: memref<2xi32, #tpu.memory_space<smem>>) -> (i32, i32, i32) {
    %0 = arith.index_cast %arg0 : i32 to index
    %1 = memref.load %arg1[%0] : memref<2xi32, #tpu.memory_space<smem>>
    %c0_i32 = arith.constant 0 : i32
    %c0_i32_0 = arith.constant 0 : i32
    %c0_i32_1 = arith.constant 0 : i32
    return %1, %c0_i32, %c0_i32_0 : i32, i32, i32
  }
  func.func @transform_7(%arg0: i32, %arg1: memref<2xi32, #tpu.memory_space<smem>>) -> (i32, i32, i32) {
    %c0_i32 = arith.constant 0 : i32
    %c0_i32_0 = arith.constant 0 : i32
    %c0_i32_1 = arith.constant 0 : i32
    return %arg0, %c0_i32, %c0_i32_0 : i32, i32, i32
  }
  func.func @transform_8(%arg0: i32, %arg1: memref<2xi32, #tpu.memory_space<smem>>) -> (i32, i32, i32) {
    %c0_i32 = arith.constant 0 : i32
    %c0_i32_0 = arith.constant 0 : i32
    %c0_i32_1 = arith.constant 0 : i32
    return %arg0, %c0_i32, %c0_i32_0 : i32, i32, i32
  }
  func.func @transform_9(%arg0: i32, %arg1: memref<2xi32, #tpu.memory_space<smem>>) -> (i32, i32, i32) {
    %c0_i32 = arith.constant 0 : i32
    %c0_i32_0 = arith.constant 0 : i32
    %c0_i32_1 = arith.constant 0 : i32
    return %arg0, %c0_i32, %c0_i32_0 : i32, i32, i32
  }
}

module attributes {stable_mosaic.version = 11 : i64} {
  func.func @_encoder_kernel(%arg0: i32, %arg1: memref<2xi32, #tpu.memory_space<smem>>, %arg2: memref<1x1x64xf32, #tpu.memory_space<vmem>>, %arg3: memref<1x16x32xf32, #tpu.memory_space<vmem>>, %arg4: memref<1x1x128xf32, #tpu.memory_space<vmem>>, %arg5: memref<1x64x128xbf16, #tpu.memory_space<vmem>>, %arg6: memref<1x1x128xf32, #tpu.memory_space<vmem>>, %arg7: memref<1x128x128xbf16, #tpu.memory_space<vmem>>, %arg8: memref<1x1x128xf32, #tpu.memory_space<vmem>>, %arg9: memref<1x32x128xbf16, #tpu.memory_space<vmem>>, %arg10: memref<1x1x128xf32, #tpu.memory_space<vmem>>, %arg11: memref<1x128x128xbf16, #tpu.memory_space<vmem>>, %arg12: memref<1x128x128xbf16, #tpu.memory_space<vmem>>, %arg13: memref<1x1x128xf32, #tpu.memory_space<vmem>>, %arg14: memref<1x128x128xbf16, #tpu.memory_space<vmem>>, %arg15: memref<1x1x128xf32, #tpu.memory_space<vmem>>, %arg16: memref<16x128xf32, #tpu.memory_space<vmem>>, %arg17: memref<4x128xf32, #tpu.memory_space<vmem>>, %arg18: memref<1x21x128xf32, #tpu.memory_space<vmem>>) attributes {dimension_semantics = [#tpu.dimension_semantics<parallel>], iteration_bounds = array<i64: 2>, scalar_prefetch = 1 : i64, scratch_operands = 0 : i64, tpu.core_type = #tpu.core_type<tc>, window_params = [{transform_indices = @transform_0, window_bounds = array<i64: 1, 1, 64>}, {transform_indices = @transform_1, window_bounds = array<i64: 1, 16, 32>}, {transform_indices = @transform_2, window_bounds = array<i64: 1, 1, 128>}, {transform_indices = @transform_3, window_bounds = array<i64: 1, 64, 128>}, {transform_indices = @transform_4, window_bounds = array<i64: 1, 1, 128>}, {transform_indices = @transform_5, window_bounds = array<i64: 1, 128, 128>}, {transform_indices = @transform_6, window_bounds = array<i64: 1, 1, 128>}, {transform_indices = @transform_7, window_bounds = array<i64: 1, 32, 128>}, {transform_indices = @transform_8, window_bounds = array<i64: 1, 1, 128>}, {transform_indices = @transform_9, window_bounds = array<i64: 1, 128, 128>}, {transform_indices = @transform_10, window_bounds = array<i64: 1, 128, 128>}, {transform_indices = @transform_11, window_bounds = array<i64: 1, 1, 128>}, {transform_indices = @transform_12, window_bounds = array<i64: 1, 128, 128>}, {transform_indices = @transform_13, window_bounds = array<i64: 1, 1, 128>}, {pipeline_mode = #tpu.pipeline_mode<synchronous>, transform_indices = @transform_14, window_bounds = array<i64: 16, 128>}, {pipeline_mode = #tpu.pipeline_mode<synchronous>, transform_indices = @transform_15, window_bounds = array<i64: 4, 128>}, {transform_indices = @transform_16, window_bounds = array<i64: 1, 21, 128>}]} {
    %c0 = arith.constant 0 : index
    %c0_0 = arith.constant 0 : index
    %c0_1 = arith.constant 0 : index
    %0 = vector.load %arg2[%c0, %c0_0, %c0_1] : memref<1x1x64xf32, #tpu.memory_space<vmem>>, vector<1x1x64xf32>
    %1 = vector.shape_cast %0 : vector<1x1x64xf32> to vector<1x64xf32>
    %c0_2 = arith.constant 0 : index
    %c0_3 = arith.constant 0 : index
    %c0_4 = arith.constant 0 : index
    %2 = vector.load %arg5[%c0_2, %c0_3, %c0_4] : memref<1x64x128xbf16, #tpu.memory_space<vmem>>, vector<1x64x128xbf16>
    %3 = vector.shape_cast %2 : vector<1x64x128xbf16> to vector<64x128xbf16>
    %4 = arith.truncf %1 : vector<1x64xf32> to vector<1x64xbf16>
    %cst = arith.constant dense<0.000000e+00> : vector<1x128xf32>
    %5 = tpu.matmul %4, %3, %cst {dimension_numbers = #tpu.dot_dimension_numbers<[1], [0], [0], [1], [0, 0, 1, 1], [], []>} : vector<1x64xbf16>, vector<64x128xbf16>, vector<1x128xf32> -> vector<1x128xf32>
    %c0_5 = arith.constant 0 : index
    %c0_6 = arith.constant 0 : index
    %c0_7 = arith.constant 0 : index
    %6 = vector.load %arg6[%c0_5, %c0_6, %c0_7] : memref<1x1x128xf32, #tpu.memory_space<vmem>>, vector<1x1x128xf32>
    %7 = vector.shape_cast %6 : vector<1x1x128xf32> to vector<1x128xf32>
    %8 = arith.addf %5, %7 : vector<1x128xf32>
    %cst_8 = arith.constant 0.000000e+00 : f32
    %9 = vector.broadcast %cst_8 : f32 to vector<1x128xf32>
    %10 = arith.maximumf %8, %9 : vector<1x128xf32>
    %c0_9 = arith.constant 0 : index
    %c0_10 = arith.constant 0 : index
    %c0_11 = arith.constant 0 : index
    %11 = vector.load %arg7[%c0_9, %c0_10, %c0_11] : memref<1x128x128xbf16, #tpu.memory_space<vmem>>, vector<1x128x128xbf16>
    %12 = vector.shape_cast %11 : vector<1x128x128xbf16> to vector<128x128xbf16>
    %13 = arith.truncf %10 : vector<1x128xf32> to vector<1x128xbf16>
    %cst_12 = arith.constant dense<0.000000e+00> : vector<1x128xf32>
    %14 = tpu.matmul %13, %12, %cst_12 {dimension_numbers = #tpu.dot_dimension_numbers<[1], [0], [0], [1], [0, 0, 1, 1], [], []>} : vector<1x128xbf16>, vector<128x128xbf16>, vector<1x128xf32> -> vector<1x128xf32>
    %c0_13 = arith.constant 0 : index
    %c0_14 = arith.constant 0 : index
    %c0_15 = arith.constant 0 : index
    %15 = vector.load %arg8[%c0_13, %c0_14, %c0_15] : memref<1x1x128xf32, #tpu.memory_space<vmem>>, vector<1x1x128xf32>
    %16 = vector.shape_cast %15 : vector<1x1x128xf32> to vector<1x128xf32>
    %17 = arith.addf %14, %16 : vector<1x128xf32>
    %c0_16 = arith.constant 0 : index
    %c0_17 = arith.constant 0 : index
    %c0_18 = arith.constant 0 : index
    %18 = vector.load %arg3[%c0_16, %c0_17, %c0_18] : memref<1x16x32xf32, #tpu.memory_space<vmem>>, vector<1x16x32xf32>
    %19 = vector.shape_cast %18 : vector<1x16x32xf32> to vector<16x32xf32>
    %c0_19 = arith.constant 0 : index
    %c0_20 = arith.constant 0 : index
    %c0_21 = arith.constant 0 : index
    %20 = vector.load %arg9[%c0_19, %c0_20, %c0_21] : memref<1x32x128xbf16, #tpu.memory_space<vmem>>, vector<1x32x128xbf16>
    %21 = vector.shape_cast %20 : vector<1x32x128xbf16> to vector<32x128xbf16>
    %22 = arith.truncf %19 : vector<16x32xf32> to vector<16x32xbf16>
    %cst_22 = arith.constant dense<0.000000e+00> : vector<16x128xf32>
    %23 = tpu.matmul %22, %21, %cst_22 {dimension_numbers = #tpu.dot_dimension_numbers<[1], [0], [0], [1], [0, 0, 1, 1], [], []>} : vector<16x32xbf16>, vector<32x128xbf16>, vector<16x128xf32> -> vector<16x128xf32>
    %c0_23 = arith.constant 0 : index
    %c0_24 = arith.constant 0 : index
    %c0_25 = arith.constant 0 : index
    %24 = vector.load %arg10[%c0_23, %c0_24, %c0_25] : memref<1x1x128xf32, #tpu.memory_space<vmem>>, vector<1x1x128xf32>
    %25 = vector.shape_cast %24 : vector<1x1x128xf32> to vector<1x128xf32>
    %26 = vector.broadcast %25 : vector<1x128xf32> to vector<16x128xf32>
    %27 = arith.addf %23, %26 : vector<16x128xf32>
    %c0_26 = arith.constant 0 : index
    %c0_27 = arith.constant 0 : index
    %c0_28 = arith.constant 0 : index
    %28 = vector.load %arg4[%c0_26, %c0_27, %c0_28] : memref<1x1x128xf32, #tpu.memory_space<vmem>>, vector<1x1x128xf32>
    %29 = vector.shape_cast %28 : vector<1x1x128xf32> to vector<1x128xf32>
    %c0_29 = arith.constant 0 : index
    %c0_30 = arith.constant 0 : index
    %c0_31 = arith.constant 0 : index
    %30 = vector.load %arg12[%c0_29, %c0_30, %c0_31] : memref<1x128x128xbf16, #tpu.memory_space<vmem>>, vector<1x128x128xbf16>
    %31 = vector.shape_cast %30 : vector<1x128x128xbf16> to vector<128x128xbf16>
    %32 = arith.truncf %29 : vector<1x128xf32> to vector<1x128xbf16>
    %cst_32 = arith.constant dense<0.000000e+00> : vector<1x128xf32>
    %33 = tpu.matmul %32, %31, %cst_32 {dimension_numbers = #tpu.dot_dimension_numbers<[1], [0], [0], [1], [0, 0, 1, 1], [], []>} : vector<1x128xbf16>, vector<128x128xbf16>, vector<1x128xf32> -> vector<1x128xf32>
    %c0_33 = arith.constant 0 : index
    %c0_34 = arith.constant 0 : index
    %c0_35 = arith.constant 0 : index
    %34 = vector.load %arg11[%c0_33, %c0_34, %c0_35] : memref<1x128x128xbf16, #tpu.memory_space<vmem>>, vector<1x128x128xbf16>
    %35 = vector.shape_cast %34 : vector<1x128x128xbf16> to vector<128x128xbf16>
    %36 = arith.truncf %27 : vector<16x128xf32> to vector<16x128xbf16>
    %cst_36 = arith.constant dense<0.000000e+00> : vector<16x128xf32>
    %37 = tpu.matmul %36, %35, %cst_36 {dimension_numbers = #tpu.dot_dimension_numbers<[1], [0], [0], [1], [0, 0, 1, 1], [], []>} : vector<16x128xbf16>, vector<128x128xbf16>, vector<16x128xf32> -> vector<16x128xf32>
    %38 = vector.broadcast %33 : vector<1x128xf32> to vector<16x128xf32>
    %39 = arith.addf %37, %38 : vector<16x128xf32>
    %c0_37 = arith.constant 0 : index
    %c0_38 = arith.constant 0 : index
    %c0_39 = arith.constant 0 : index
    %40 = vector.load %arg13[%c0_37, %c0_38, %c0_39] : memref<1x1x128xf32, #tpu.memory_space<vmem>>, vector<1x1x128xf32>
    %41 = vector.shape_cast %40 : vector<1x1x128xf32> to vector<1x128xf32>
    %42 = vector.broadcast %41 : vector<1x128xf32> to vector<16x128xf32>
    %43 = arith.addf %39, %42 : vector<16x128xf32>
    %44 = arith.negf %43 : vector<16x128xf32>
    %45 = math.exp %44 : vector<16x128xf32>
    %cst_40 = arith.constant 1.000000e+00 : f32
    %46 = vector.broadcast %cst_40 : f32 to vector<16x128xf32>
    %47 = arith.addf %46, %45 : vector<16x128xf32>
    %48 = arith.divf %46, %47 : vector<16x128xf32>
    %49 = arith.mulf %43, %48 : vector<16x128xf32>
    %c0_41 = arith.constant 0 : index
    %c0_42 = arith.constant 0 : index
    %c0_43 = arith.constant 0 : index
    %50 = vector.load %arg14[%c0_41, %c0_42, %c0_43] : memref<1x128x128xbf16, #tpu.memory_space<vmem>>, vector<1x128x128xbf16>
    %51 = vector.shape_cast %50 : vector<1x128x128xbf16> to vector<128x128xbf16>
    %52 = arith.truncf %49 : vector<16x128xf32> to vector<16x128xbf16>
    %cst_44 = arith.constant dense<0.000000e+00> : vector<16x128xf32>
    %53 = tpu.matmul %52, %51, %cst_44 {dimension_numbers = #tpu.dot_dimension_numbers<[1], [0], [0], [1], [0, 0, 1, 1], [], []>} : vector<16x128xbf16>, vector<128x128xbf16>, vector<16x128xf32> -> vector<16x128xf32>
    %c0_45 = arith.constant 0 : index
    %c0_46 = arith.constant 0 : index
    %c0_47 = arith.constant 0 : index
    %54 = vector.load %arg15[%c0_45, %c0_46, %c0_47] : memref<1x1x128xf32, #tpu.memory_space<vmem>>, vector<1x1x128xf32>
    %55 = vector.shape_cast %54 : vector<1x1x128xf32> to vector<1x128xf32>
    %56 = vector.broadcast %55 : vector<1x128xf32> to vector<16x128xf32>
    %57 = arith.addf %53, %56 : vector<16x128xf32>
    %c0_48 = arith.constant 0 : index
    %c0_49 = arith.constant 0 : index
    %58 = vector.load %arg16[%c0_48, %c0_49] : memref<16x128xf32, #tpu.memory_space<vmem>>, vector<16x128xf32>
    %59 = arith.addf %57, %58 : vector<16x128xf32>
    %c0_50 = arith.constant 0 : index
    %c0_51 = arith.constant 0 : index
    %c0_52 = arith.constant 0 : index
    %60 = vector.load %arg18[%c0_50, %c0_51, %c0_52] : memref<1x21x128xf32, #tpu.memory_space<vmem>>, vector<1x1x128xf32>
    %61 = vector.shape_cast %60 : vector<1x1x128xf32> to vector<1x128xf32>
    %62 = vector.shape_cast %17 : vector<1x128xf32> to vector<1x1x128xf32>
    tpu.vector_store %arg18[%c0_50, %c0_51, %c0_52], %62 {strides = array<i32>} : memref<1x21x128xf32, #tpu.memory_space<vmem>>, vector<1x1x128xf32>,
    %c0_53 = arith.constant 0 : index
    %c0_54 = arith.constant 0 : index
    %63 = vector.load %arg17[%c0_53, %c0_54] : memref<4x128xf32, #tpu.memory_space<vmem>>, vector<4x128xf32>
    %c0_55 = arith.constant 0 : index
    %c1 = arith.constant 1 : index
    %c0_56 = arith.constant 0 : index
    %64 = vector.load %arg18[%c0_55, %c1, %c0_56] : memref<1x21x128xf32, #tpu.memory_space<vmem>>, vector<1x4x128xf32>
    %65 = vector.shape_cast %64 : vector<1x4x128xf32> to vector<4x128xf32>
    %66 = vector.shape_cast %63 : vector<4x128xf32> to vector<1x4x128xf32>
    tpu.vector_store %arg18[%c0_55, %c1, %c0_56], %66 {strides = array<i32>} : memref<1x21x128xf32, #tpu.memory_space<vmem>>, vector<1x4x128xf32>,
    %c0_57 = arith.constant 0 : index
    %c5 = arith.constant 5 : index
    %c0_58 = arith.constant 0 : index
    %67 = vector.load %arg18[%c0_57, %c5, %c0_58] : memref<1x21x128xf32, #tpu.memory_space<vmem>>, vector<1x16x128xf32>
    %68 = vector.shape_cast %67 : vector<1x16x128xf32> to vector<16x128xf32>
    %69 = vector.shape_cast %59 : vector<16x128xf32> to vector<1x16x128xf32>
    tpu.vector_store %arg18[%c0_57, %c5, %c0_58], %69 {strides = array<i32>} : memref<1x21x128xf32, #tpu.memory_space<vmem>>, vector<1x16x128xf32>,
    return
  }
  func.func @transform_0(%arg0: i32, %arg1: memref<2xi32, #tpu.memory_space<smem>>) -> (i32, i32, i32) {
    %c0_i32 = arith.constant 0 : i32
    %c0_i32_0 = arith.constant 0 : i32
    %c0_i32_1 = arith.constant 0 : i32
    return %arg0, %c0_i32, %c0_i32_0 : i32, i32, i32
  }
  func.func @transform_1(%arg0: i32, %arg1: memref<2xi32, #tpu.memory_space<smem>>) -> (i32, i32, i32) {
    %c0_i32 = arith.constant 0 : i32
    %c0_i32_0 = arith.constant 0 : i32
    %c0_i32_1 = arith.constant 0 : i32
    return %arg0, %c0_i32, %c0_i32_0 : i32, i32, i32
  }
  func.func @transform_2(%arg0: i32, %arg1: memref<2xi32, #tpu.memory_space<smem>>) -> (i32, i32, i32) {
    %c0_i32 = arith.constant 0 : i32
    %c0_i32_0 = arith.constant 0 : i32
    %c0_i32_1 = arith.constant 0 : i32
    return %arg0, %c0_i32, %c0_i32_0 : i32, i32, i32
  }
  func.func @transform_3(%arg0: i32, %arg1: memref<2xi32, #tpu.memory_space<smem>>) -> (i32, i32, i32) {
    %0 = arith.index_cast %arg0 : i32 to index
    %1 = memref.load %arg1[%0] : memref<2xi32, #tpu.memory_space<smem>>
    %c0_i32 = arith.constant 0 : i32
    %c0_i32_0 = arith.constant 0 : i32
    %c0_i32_1 = arith.constant 0 : i32
    return %1, %c0_i32, %c0_i32_0 : i32, i32, i32
  }
  func.func @transform_4(%arg0: i32, %arg1: memref<2xi32, #tpu.memory_space<smem>>) -> (i32, i32, i32) {
    %0 = arith.index_cast %arg0 : i32 to index
    %1 = memref.load %arg1[%0] : memref<2xi32, #tpu.memory_space<smem>>
    %c0_i32 = arith.constant 0 : i32
    %c0_i32_0 = arith.constant 0 : i32
    %c0_i32_1 = arith.constant 0 : i32
    return %1, %c0_i32, %c0_i32_0 : i32, i32, i32
  }
  func.func @transform_5(%arg0: i32, %arg1: memref<2xi32, #tpu.memory_space<smem>>) -> (i32, i32, i32) {
    %0 = arith.index_cast %arg0 : i32 to index
    %1 = memref.load %arg1[%0] : memref<2xi32, #tpu.memory_space<smem>>
    %c0_i32 = arith.constant 0 : i32
    %c0_i32_0 = arith.constant 0 : i32
    %c0_i32_1 = arith.constant 0 : i32
    return %1, %c0_i32, %c0_i32_0 : i32, i32, i32
  }
  func.func @transform_6(%arg0: i32, %arg1: memref<2xi32, #tpu.memory_space<smem>>) -> (i32, i32, i32) {
    %0 = arith.index_cast %arg0 : i32 to index
    %1 = memref.load %arg1[%0] : memref<2xi32, #tpu.memory_space<smem>>
    %c0_i32 = arith.constant 0 : i32
    %c0_i32_0 = arith.constant 0 : i32
    %c0_i32_1 = arith.constant 0 : i32
    return %1, %c0_i32, %c0_i32_0 : i32, i32, i32
  }
  func.func @transform_7(%arg0: i32, %arg1: memref<2xi32, #tpu.memory_space<smem>>) -> (i32, i32, i32) {
    %0 = arith.index_cast %arg0 : i32 to index
    %1 = memref.load %arg1[%0] : memref<2xi32, #tpu.memory_space<smem>>
    %c0_i32 = arith.constant 0 : i32
    %c0_i32_0 = arith.constant 0 : i32
    %c0_i32_1 = arith.constant 0 : i32
    return %1, %c0_i32, %c0_i32_0 : i32, i32, i32
  }
  func.func @transform_8(%arg0: i32, %arg1: memref<2xi32, #tpu.memory_space<smem>>) -> (i32, i32, i32) {
    %0 = arith.index_cast %arg0 : i32 to index
    %1 = memref.load %arg1[%0] : memref<2xi32, #tpu.memory_space<smem>>
    %c0_i32 = arith.constant 0 : i32
    %c0_i32_0 = arith.constant 0 : i32
    %c0_i32_1 = arith.constant 0 : i32
    return %1, %c0_i32, %c0_i32_0 : i32, i32, i32
  }
  func.func @transform_9(%arg0: i32, %arg1: memref<2xi32, #tpu.memory_space<smem>>) -> (i32, i32, i32) {
    %0 = arith.index_cast %arg0 : i32 to index
    %1 = memref.load %arg1[%0] : memref<2xi32, #tpu.memory_space<smem>>
    %c0_i32 = arith.constant 0 : i32
    %c0_i32_0 = arith.constant 0 : i32
    %c0_i32_1 = arith.constant 0 : i32
    return %1, %c0_i32, %c0_i32_0 : i32, i32, i32
  }
  func.func @transform_10(%arg0: i32, %arg1: memref<2xi32, #tpu.memory_space<smem>>) -> (i32, i32, i32) {
    %0 = arith.index_cast %arg0 : i32 to index
    %1 = memref.load %arg1[%0] : memref<2xi32, #tpu.memory_space<smem>>
    %c0_i32 = arith.constant 0 : i32
    %c0_i32_0 = arith.constant 0 : i32
    %c0_i32_1 = arith.constant 0 : i32
    return %1, %c0_i32, %c0_i32_0 : i32, i32, i32
  }
  func.func @transform_11(%arg0: i32, %arg1: memref<2xi32, #tpu.memory_space<smem>>) -> (i32, i32, i32) {
    %0 = arith.index_cast %arg0 : i32 to index
    %1 = memref.load %arg1[%0] : memref<2xi32, #tpu.memory_space<smem>>
    %c0_i32 = arith.constant 0 : i32
    %c0_i32_0 = arith.constant 0 : i32
    %c0_i32_1 = arith.constant 0 : i32
    return %1, %c0_i32, %c0_i32_0 : i32, i32, i32
  }
  func.func @transform_12(%arg0: i32, %arg1: memref<2xi32, #tpu.memory_space<smem>>) -> (i32, i32, i32) {
    %0 = arith.index_cast %arg0 : i32 to index
    %1 = memref.load %arg1[%0] : memref<2xi32, #tpu.memory_space<smem>>
    %c0_i32 = arith.constant 0 : i32
    %c0_i32_0 = arith.constant 0 : i32
    %c0_i32_1 = arith.constant 0 : i32
    return %1, %c0_i32, %c0_i32_0 : i32, i32, i32
  }
  func.func @transform_13(%arg0: i32, %arg1: memref<2xi32, #tpu.memory_space<smem>>) -> (i32, i32, i32) {
    %0 = arith.index_cast %arg0 : i32 to index
    %1 = memref.load %arg1[%0] : memref<2xi32, #tpu.memory_space<smem>>
    %c0_i32 = arith.constant 0 : i32
    %c0_i32_0 = arith.constant 0 : i32
    %c0_i32_1 = arith.constant 0 : i32
    return %1, %c0_i32, %c0_i32_0 : i32, i32, i32
  }
  func.func @transform_14(%arg0: i32, %arg1: memref<2xi32, #tpu.memory_space<smem>>) -> (i32, i32) {
    %c0_i32 = arith.constant 0 : i32
    %c0_i32_0 = arith.constant 0 : i32
    %c0_i32_1 = arith.constant 0 : i32
    return %c0_i32, %c0_i32_0 : i32, i32
  }
  func.func @transform_15(%arg0: i32, %arg1: memref<2xi32, #tpu.memory_space<smem>>) -> (i32, i32) {
    %c0_i32 = arith.constant 0 : i32
    %c0_i32_0 = arith.constant 0 : i32
    %c0_i32_1 = arith.constant 0 : i32
    return %c0_i32, %c0_i32_0 : i32, i32
  }
  func.func @transform_16(%arg0: i32, %arg1: memref<2xi32, #tpu.memory_space<smem>>) -> (i32, i32, i32) {
    %c0_i32 = arith.constant 0 : i32
    %c0_i32_0 = arith.constant 0 : i32
    %c0_i32_1 = arith.constant 0 : i32
    return %arg0, %c0_i32, %c0_i32_0 : i32, i32, i32
  }
}

module attributes {stable_mosaic.version = 11 : i64} {
  func.func @_layernorm_kernel(%arg0: i32, %arg1: memref<16x128xf32, #tpu.memory_space<vmem>>, %arg2: memref<1x128xf32, #tpu.memory_space<vmem>>, %arg3: memref<1x128xf32, #tpu.memory_space<vmem>>, %arg4: memref<16x128xf32, #tpu.memory_space<vmem>>) attributes {dimension_semantics = [#tpu.dimension_semantics<parallel>], iteration_bounds = array<i64: 1>, scalar_prefetch = 0 : i64, scratch_operands = 0 : i64, tpu.core_type = #tpu.core_type<tc>, window_params = [{transform_indices = @transform_0, window_bounds = array<i64: 16, 128>}, {pipeline_mode = #tpu.pipeline_mode<synchronous>, transform_indices = @transform_1, window_bounds = array<i64: 1, 128>}, {pipeline_mode = #tpu.pipeline_mode<synchronous>, transform_indices = @transform_2, window_bounds = array<i64: 1, 128>}, {transform_indices = @transform_3, window_bounds = array<i64: 16, 128>}]} {
    %c0 = arith.constant 0 : index
    %c0_0 = arith.constant 0 : index
    %0 = vector.load %arg1[%c0, %c0_0] : memref<16x128xf32, #tpu.memory_space<vmem>>, vector<16x128xf32>
    %cst = arith.constant dense<0.000000e+00> : vector<16xf32>
    %1 = vector.multi_reduction <add>, %0, %cst [1] : vector<16x128xf32> to vector<16xf32>
    %2 = vector.shape_cast %1 : vector<16xf32> to vector<16x1xf32>
    %cst_1 = arith.constant 1.280000e+02 : f32
    %3 = vector.broadcast %cst_1 : f32 to vector<16x1xf32>
    %4 = arith.divf %2, %3 : vector<16x1xf32>
    %5 = vector.broadcast %4 : vector<16x1xf32> to vector<16x128xf32>
    %6 = arith.subf %0, %5 : vector<16x128xf32>
    %7 = arith.mulf %6, %6 : vector<16x128xf32>
    %cst_2 = arith.constant dense<0.000000e+00> : vector<16xf32>
    %8 = vector.multi_reduction <add>, %7, %cst_2 [1] : vector<16x128xf32> to vector<16xf32>
    %9 = vector.shape_cast %8 : vector<16xf32> to vector<16x1xf32>
    %cst_3 = arith.constant 1.280000e+02 : f32
    %10 = vector.broadcast %cst_3 : f32 to vector<16x1xf32>
    %11 = arith.divf %9, %10 : vector<16x1xf32>
    %12 = vector.broadcast %4 : vector<16x1xf32> to vector<16x128xf32>
    %13 = arith.subf %0, %12 : vector<16x128xf32>
    %cst_4 = arith.constant 9.99999974E-6 : f32
    %14 = vector.broadcast %cst_4 : f32 to vector<16x1xf32>
    %15 = arith.addf %11, %14 : vector<16x1xf32>
    %16 = math.rsqrt %15 : vector<16x1xf32>
    %17 = vector.broadcast %16 : vector<16x1xf32> to vector<16x128xf32>
    %18 = arith.mulf %13, %17 : vector<16x128xf32>
    %c0_5 = arith.constant 0 : index
    %c0_6 = arith.constant 0 : index
    %19 = vector.load %arg2[%c0_5, %c0_6] : memref<1x128xf32, #tpu.memory_space<vmem>>, vector<1x128xf32>
    %20 = vector.broadcast %19 : vector<1x128xf32> to vector<16x128xf32>
    %21 = arith.mulf %18, %20 : vector<16x128xf32>
    %c0_7 = arith.constant 0 : index
    %c0_8 = arith.constant 0 : index
    %22 = vector.load %arg3[%c0_7, %c0_8] : memref<1x128xf32, #tpu.memory_space<vmem>>, vector<1x128xf32>
    %23 = vector.broadcast %22 : vector<1x128xf32> to vector<16x128xf32>
    %24 = arith.addf %21, %23 : vector<16x128xf32>
    %c0_9 = arith.constant 0 : index
    %c0_10 = arith.constant 0 : index
    %25 = vector.load %arg4[%c0_9, %c0_10] : memref<16x128xf32, #tpu.memory_space<vmem>>, vector<16x128xf32>
    tpu.vector_store %arg4[%c0_9, %c0_10], %24 {strides = array<i32>} : memref<16x128xf32, #tpu.memory_space<vmem>>, vector<16x128xf32>,
    return
  }
  func.func @transform_0(%arg0: i32) -> (i32, i32) {
    %c0_i32 = arith.constant 0 : i32
    %c0_i32_0 = arith.constant 0 : i32
    return %arg0, %c0_i32 : i32, i32
  }
  func.func @transform_1(%arg0: i32) -> (i32, i32) {
    %c0_i32 = arith.constant 0 : i32
    %c0_i32_0 = arith.constant 0 : i32
    %c0_i32_1 = arith.constant 0 : i32
    return %c0_i32, %c0_i32_0 : i32, i32
  }
  func.func @transform_2(%arg0: i32) -> (i32, i32) {
    %c0_i32 = arith.constant 0 : i32
    %c0_i32_0 = arith.constant 0 : i32
    %c0_i32_1 = arith.constant 0 : i32
    return %c0_i32, %c0_i32_0 : i32, i32
  }
  func.func @transform_3(%arg0: i32) -> (i32, i32) {
    %c0_i32 = arith.constant 0 : i32
    %c0_i32_0 = arith.constant 0 : i32
    return %arg0, %c0_i32 : i32, i32
  }
}

</mosaic_0001>

<bundles_post_ra>
// kernel: flowmatching_action_head_forward.3
= control target key start
LH: loop header
LB: loop body
LE: loop exit
PB: predicated region body
PF: predicated region fallthrough
CT: control target
= control target key end

     0   :  { %s145_s0 = inlined_call_operand.vmem [shape: f32[16,128], index: 0, kind: input, shape index: {}]   ;;  %s146_s1 = inlined_call_operand.vmem [shape: f32[1,128], index: 1, kind: input, shape index: {}]   ;;  %s147_s2 = inlined_call_operand.vmem [shape: f32[1,128], index: 2, kind: input, shape index: {}]   ;;  %s148_s3 = inlined_call_operand.hbm [shape: f32[16,128], index: 3, kind: output, shape index: {}]  }
   0x1   :  { %v15_v0 = vld [vmem:[%s145_s0] sm:$0xff] }
   0x2   :  { %8 = vsyncpa [#allocation3], 0  ;;  %17 = vadd.xlane.f32.xlu0 %v15_v0  ;;  %v16_v1 = vld [vmem:[%s145_s0 + $0x8] sm:$0xff]  ;;  %v76_v17 = vld [vmem:[%s146_s1] ss:$0 sm:$0xff]  ;;  %s107_s19 = smov [#allocation2]  }
   0x3   :  { %v77_v19 = vld [vmem:[%s147_s2] ss:$0 sm:$0xff]  ;;  %s65_s20 = sshll.u32 %s107_s19, 4  ;;  %s66_s20 = int_to_ptr.vmem [resolvable:$true] %s65_s20 }
   0x4   :  { %s85_s21 = scalar_lea.vmem %s66_s20, 256  ;;  %p90_p1 = scmp.lt.s32.totalorder %s66_s20, %s66_s20 }
   0x5   :  { %p86_p0 = scmp.ne.s32.totalorder %s66_s20, %s85_s21  ;;  %p91_p2 = scmp.lt.s32.totalorder %s85_s21, %s85_s21 }
   0x6   :  { %19 = vadd.xlane.f32.xlu0 %v16_v1 }
   0x7   :  { %p92_p3 = por %p91_p2, %p90_p1 }
   0x9   :  { %p93_p4 = pnand %p92_p3, %p86_p0 }
  0x8b   :  { %v18_v2 = vpop.xlane.xlu0 %17 }
  0x8c   :  { %v22_v3 = vmul.f32 0.0078125, %v18_v2 }
  0x8e   :  { %v24_v4 = vsub.f32 %v15_v0, %v22_v3 }
  0x8f   :  { %v20_v5 = vpop.xlane.xlu0 %19 }
  0x90   :  { %v23_v6 = vmul.f32 0.0078125, %v20_v5  ;;  %v26_v7 = vmul.f32 %v24_v4, %v24_v4 }
  0x92   :  { %v25_v8 = vsub.f32 %v16_v1, %v23_v6  ;;  %28 = vadd.xlane.f32.xlu1 %v26_v7 }
  0x94   :  { %v27_v9 = vmul.f32 %v25_v8, %v25_v8 }
  0x96   :  { %30 = vadd.xlane.f32.xlu1 %v27_v9 }
 0x11b   :  { %v29_v10 = vpop.xlane.xlu1 %28 }
 0x11c   :  { %v32_v11 = vmul.f32 0.0078125, %v29_v10 }
 0x11e   :  { %v34_v12 = vadd.f32 1e-05, %v32_v11 }
 0x11f   :  { %v31_v13 = vpop.xlane.xlu1 %30 }
 0x120   :  { %81 = vrsqrt.f32 %v34_v12  ;;  %v33_v14 = vmul.f32 0.0078125, %v31_v13 }
 0x122   :  { %v35_v15 = vadd.f32 1e-05, %v33_v14 }
 0x124   :  { %83 = vrsqrt.f32 %v35_v15 }
 0x12d   :  { %v82_v16 = vpop.eup %81 }
 0x12e   :  { %v38_v18 = vmul.f32 %v82_v16, %v24_v4 }
 0x130   :  { %v47_v20 = vmul.f32 %v76_v17, %v38_v18 }
 0x131   :  { %v84_v21 = vpop.eup %83 }
 0x132   :  { %v39_v22 = vmul.f32 %v84_v21, %v25_v8  ;;  %v56_v23 = vadd.f32 %v77_v19, %v47_v20 }
 0x134   :  { %v48_v24 = vmul.f32 %v76_v17, %v39_v22  ;;  %58 = vst [vmem:[#allocation2] sm:$0xff] %v56_v23 }
 0x136   :  { %v57_v25 = vadd.f32 %v77_v19, %v48_v24 }
 0x138   :  { %59 = vst [vmem:[#allocation2 + $0x8] sm:$0xff] %v57_v25 }
 0x139   :  { %96 = shalt.err (!%p93_p4)
}
 0x13a   :  { %s108_s1 = smov 128   ;;  %s109_s2 = smov 8  }
 0x13b   :  { %71 = dma.vmem_to_hbm [thread:$0]  %s66_s20, 256, %s148_s3, [#allocation3], %s108_s1, %s108_s1, %s109_s2  }
 0x13c   :  { %105 = dma.done.wait [#allocation3], 256  }
 0x13d   :  { %106 = vsyncadd [#allocation3], 4294967040 }
 0x13e   :  { %75 = vsyncpa [#allocation3], 1 }

// kernel: flowmatching_action_head_forward.5
= control target key start
LH: loop header
LB: loop body
LE: loop exit
PB: predicated region body
PF: predicated region fallthrough
CT: control target
= control target key end

     0   :  { %s1245_s0 = inlined_call_operand.vmem [shape: s32[2], index: 0, kind: input, shape index: {}]   ;;  %s1246_s1 = inlined_call_operand.vmem [shape: f32[2,16,128], index: 1, kind: input, shape index: {}]   ;;  %s1247_s2 = inlined_call_operand.vmem [shape: f32[2,16,128], index: 2, kind: input, shape index: {}]   ;;  %s1248_s3 = inlined_call_operand.vmem [shape: f32[2,16,128], index: 3, kind: input, shape index: {}]   ;;  %s1249_s4 = inlined_call_operand.vmem [shape: bf16[4,128,128], index: 4, kind: input, shape index: {}]   ;;  %s1250_s5 = inlined_call_operand.vmem [shape: f32[4,1,128], index: 5, kind: input, shape index: {}]   ;;  %s1251_s6 = inlined_call_operand.vmem [shape: bf16[4,128,128], index: 6, kind: input, shape index: {}]   ;;  %s1252_s7 = inlined_call_operand.vmem [shape: f32[4,1,128], index: 7, kind: input, shape index: {}]   ;;  %s1253_s8 = inlined_call_operand.vmem [shape: f32[2,16,128], index: 8, kind: output, shape index: {0}]   ;;  %s1254_s9 = inlined_call_operand.vmem [shape: f32[2,1,1], index: 9, kind: output, shape index: {1}]   ;;  %s1255_s10 = inlined_call_operand.vmem [shape: f32[2,1,1], index: 10, kind: output, shape index: {2}]  }
   0x1   :  { %s16_s15 = sshll.u32 %s1245_s0, 4  ;;  %s17_s15 = int_to_ptr.vmem [resolvable:$true] %s16_s15 }
   0x2   :  { %s1064_s16 = scalar_lea.vmem %s17_s15, 16  ;;  %p1069_p1 = scmp.lt.s32.totalorder %s17_s15, %s17_s15 }
   0x3   :  { %p1065_p0 = scmp.ne.s32.totalorder %s17_s15, %s1064_s16  ;;  %p1070_p2 = scmp.lt.s32.totalorder %s1064_s16, %s1064_s16 }
   0x5   :  { %p1071_p3 = por %p1070_p2, %p1069_p1 }
   0x7   :  { %p1072_p4 = pnand %p1071_p3, %p1065_p0 }
   0x9   :  { %1075 = shalt.err (!%p1072_p4)  }
   0xa   :  { %s1086_s17 = smov [#allocation3]  }
   0xb   :  { %19 = dma.vmem_to_smem %s17_s15, 16, %s1086_s17, [#allocation2] }
   0xc   :  { %1080 = dma.done.wait [#allocation2], 16 }
   0xd   :  { %1081 = vsyncadd [#allocation2], 4294967280 }
   0xe   :  { %21 = sfence }
   0xf   :  { %s1147_s18 = smov 0  }
  0x10 LB: > { %s1153_s0 = sadd.s32 4294967295, %s1084_s18   ;;  %p936_p5 = scmp.ge.s32.totalorder %s1084_s18, 1  ;;  %s1084_s18 = sphi %s1147_s18, %s27_s18  }
  0x11   : > { %p371_p6 = scmp.lt.s32.totalorder %s1084_s18, 3 }
  0x13   : > { %p372_p7 = pnand %p936_p5, %p371_p6 }
  0x14   : > { %s458_s19 = sld [smem:[#allocation3 + %s1153_s0]] (!%p372_p7)  ;;  %p443_p10 = scmp.lt.s32.totalorder (!%p372_p7), %s1153_s0, 1 }
  0x15   : > { %375 = sbr.rel (%p372_p7) target bundleno = 679 (0x2a7), region = 48  ;;  %s470_s20 = sld [smem:[#allocation3 + %s1153_s0]] (!%p372_p7) }
  0x16   : > { %s465_s14 = sld [smem:[#allocation3 + %s1153_s0]] (!%p372_p7) }
  0x1a   : > { %v1087_v0 = vmov 0.0   ;;  %vm1088_vm0 = vmmov 0   ;;  %p459_p8 = scmp.lt.s32.totalorder %s458_s19, 3  ;;  %vm747_vm1 = vcmask 0  }
  0x1b   : > { %993 = vmatprep.subr.bf16.mxu0 %v1087_v0  ;;  %1009 = vmatprep.mubr.msk.bf16.mxu0 %vm1088_vm0, %v1087_v0  ;;  %p471_p9 = scmp.lt.s32.totalorder %s470_s20, 3 }
  0x1c   : > { %1013 = vmatprep.subr.bf16.mxu1 %v1087_v0  ;;  %1029 = vmatprep.mubr.msk.bf16.mxu1 %vm1088_vm0, %v1087_v0  ;;  %s1257_s19 = smov (!%p459_p8, %s458_s19), 3  ;;  %p466_p11 = scmp.lt.s32.totalorder %s465_s14, 3 }
  0x1d   : > { %s1259_s20 = smov (!%p471_p9, %s470_s20), 3  ;;  %s972_s21 = sshll.u32 %s1257_s19, 6 }
  0x1e   : > { %s1166_s24 = scalar_lea.vmem %s1249_s4, %s972_s21  ;;  %s973_s25 = sshll.u32 %s1259_s20, 6 }
  0x1f   : > { %v1048_v1 = vld [vmem:[%s1166_s24 + $0x38] sm:$0xff]   ;;  %v1049_v2 = vld [vmem:[%s1166_s24 + $0x30] sm:$0xff]   ;;  %s1174_s28 = scalar_lea.vmem %s1251_s6, %s973_s25  ;;  %v1050_v3 = vld [vmem:[%s1166_s24 + $0x28] sm:$0xff]   ;;  %s1261_s14 = smov (!%p466_p11, %s465_s14), 3 }
  0x20   : > { %994 = vmatpush3.bf16.msra.mxu0 %v1048_v1  ;;  %v1056_v4 = vld [vmem:[%s1174_s28 + $0x38] sm:$0xff]   ;;  %v1051_v5 = vld [vmem:[%s1166_s24 + $0x20] sm:$0xff]   ;;  %v1057_v6 = vld [vmem:[%s1174_s28 + $0x30] sm:$0xff]   ;;  %s1189_s29 = scalar_select %p443_p10, %s1153_s0, 1 }
  0x21   : > { %995 = vmatprep.subr.bf16.mxu0 %v1087_v0  ;;  %1014 = vmatpush3.bf16.msra.mxu1 %v1056_v4  ;;  %v1052_v7 = vld [vmem:[%s1166_s24 + $0x18] sm:$0xff]   ;;  %v1058_v8 = vld [vmem:[%s1174_s28 + $0x28] sm:$0xff]   ;;  %v1053_v9 = vld [vmem:[%s1166_s24 + $0x10] sm:$0xff]   ;;  %s468_s17 = scalar_lea.vmem %s1250_s5, %s1261_s14  ;;  %s477_s19 = sld [smem:[#allocation3 + %s1153_s0]] }
  0x22   : > { %1015 = vmatprep.subr.bf16.mxu1 %v1087_v0  ;;  %v1059_v10 = vld [vmem:[%s1174_s28 + $0x20] sm:$0xff]   ;;  %s1196_s30 = sshll.u32 %s1189_s29, 4  ;;  %v1054_v11 = vld [vmem:[%s1166_s24 + $0x8] sm:$0xff]   ;;  %v1060_v12 = vld [vmem:[%s1174_s28 + $0x18] sm:$0xff]   ;;  %s489_s14 = scalar_lea.vmem %s1254_s9, %s1189_s29 }
  0x23   : > { %s447_s13 = scalar_lea.vmem %s1246_s1, %s1196_s30  ;;  %v1055_v13 = vld [vmem:[%s1166_s24] sm:$0xff]   ;;  %v1061_v17 = vld [vmem:[%s1174_s28 + $0x10] sm:$0xff]   ;;  %v1062_v18 = vld [vmem:[%s1174_s28 + $0x8] sm:$0xff]   ;;  %s452_s25 = scalar_lea.vmem %s1247_s2, %s1196_s30 }
  0x24   : > { %996 = vmatpush3.bf16.msra.mxu0 %v1049_v2  ;;  %v494_v14 = vld [vmem:[%s447_s13] sm:$0xff]  ;;  %v495_v15 = vld [vmem:[%s447_s13 + $0x8] sm:$0xff]  ;;  %s457_s12 = scalar_lea.vmem %s1248_s3, %s1196_s30 }
  0x25   : > { %997 = vmatprep.subr.bf16.mxu0 %v1087_v0  ;;  %1016 = vmatpush3.bf16.msra.mxu1 %v1057_v6  ;;  %v512_v16 = vpack.c.bf16 %v495_v15, %v494_v14  ;;  %v1063_v19 = vld [vmem:[%s1174_s28] sm:$0xff]   ;;  %s486_s28 = scalar_lea.vmem %s1253_s8, %s1196_s30  ;;  %v727_v37 = vld [vmem:[%s452_s25 + $0x8] sm:$0xff] }
  0x26   : > { %1017 = vmatprep.subr.bf16.mxu1 %v1087_v0  ;;  %v949_v20 = vld [vmem:[%s468_s17] ss:$0 sm:$0xff]  ;;  %v731_v43 = vld [vmem:[%s457_s12 + $0x8] sm:$0xff] }
  0x27   : > { %p478_p12 = scmp.lt.s32.totalorder %s477_s19, 3  ;;  %v726_v32 = vld [vmem:[%s452_s25] sm:$0xff] }
  0x28   : > { %998 = vmatpush3.bf16.msra.mxu0 %v1050_v3  ;;  %v730_v42 = vld [vmem:[%s457_s12] sm:$0xff] }
  0x29   : > { %999 = vmatprep.subr.bf16.mxu0 %v1087_v0  ;;  %1018 = vmatpush3.bf16.msra.mxu1 %v1058_v8  ;;  %s1263_s19 = smov (!%p478_p12, %s477_s19), 3  ;;  %v749_v48 = vadd.f32 %v731_v43, %v730_v42 }
  0x2a   : > { %1019 = vmatprep.subr.bf16.mxu1 %v1087_v0  ;;  %s480_s22 = scalar_lea.vmem %s1252_s7, %s1263_s19  ;;  %s492_s19 = scalar_lea.vmem %s1255_s10, %s1189_s29 }
  0x2b   : > { %v958_v30 = vld [vmem:[%s480_s22] ss:$0 sm:$0xff] }
  0x2c   : > { %1000 = vmatpush3.bf16.msra.mxu0 %v1051_v5 }
  0x2d   : > { %1001 = vmatprep.subr.bf16.mxu0 %v1087_v0  ;;  %1020 = vmatpush3.bf16.msra.mxu1 %v1059_v10 }
  0x2e   : > { %1021 = vmatprep.subr.bf16.mxu1 %v1087_v0 }
  0x30   : > { %1002 = vmatpush3.bf16.msra.mxu0 %v1052_v7 }
  0x31   : > { %1003 = vmatprep.subr.bf16.mxu0 %v1087_v0  ;;  %1022 = vmatpush3.bf16.msra.mxu1 %v1060_v12 }
  0x32   : > { %1023 = vmatprep.subr.bf16.mxu1 %v1087_v0 }
  0x34   : > { %1004 = vmatpush3.bf16.msra.mxu0 %v1053_v9 }
  0x35   : > { %1005 = vmatprep.subr.bf16.mxu0 %v1087_v0  ;;  %1024 = vmatpush3.bf16.msra.mxu1 %v1061_v17 }
  0x36   : > { %1025 = vmatprep.subr.bf16.mxu1 %v1087_v0 }
  0x38   : > { %1006 = vmatpush3.bf16.msra.mxu0 %v1054_v11 }
  0x39   : > { %1007 = vmatprep.subr.bf16.mxu0 %v1087_v0  ;;  %1026 = vmatpush3.bf16.msra.mxu1 %v1062_v18 }
  0x3a   : > { %1027 = vmatprep.subr.bf16.mxu1 %v1087_v0 }
  0x3c   : > { %1008 = vmatpush3.bf16.msra.mxu0 %v1055_v13 }
  0x3d   : > { %1028 = vmatpush3.bf16.msra.mxu1 %v1063_v19 }
  0x3f   : > { %1010 = vmatmul.mubr.bf16.vlgmr.msra.gmra.mxu0 %v512_v16 }
  0xff   : > { %v602_v21 = vpop.f32.mrf.mxu0 }
 0x100   : > { %v603_v23 = vadd.f32 %v949_v20, %v602_v21 }
 0x101   : > { %v1011_v22 = vpop.f32.mrf.mxu0 }
 0x102   : > { %v609_v27 = vmax.f32 %v603_v23, 0.0 }
 0x103   : > { %v605_v24 = vpop.f32.mrf.mxu0 }
 0x104   : > { %v606_v25 = vadd.f32 %v949_v20, %v605_v24 }
 0x105   : > { %v1012_v26 = vpop.f32.mrf.mxu0 }
 0x106   : > { %v610_v28 = vmax.f32 %v606_v25, 0.0 }
 0x108   : > { %v627_v29 = vpack.c.bf16 %v610_v28, %v609_v27 }
 0x10a   : > { %1030 = vmatmul.mubr.bf16.vlgmr.msra.gmra.mxu1 %v627_v29 }
 0x1ca   : > { %v717_v31 = vpop.f32.mrf.mxu1 }
 0x1cb   : > { %v718_v33 = vadd.f32 %v958_v30, %v717_v31 }
 0x1cc   : > { %v1031_v34 = vpop.f32.mrf.mxu1 }
 0x1cd   : > { %724 = vst [vmem:[%s486_s28] sm:$0xff] %v718_v33  ;;  %v728_v35 = vsub.f32 %v718_v33, %v726_v32 }
 0x1ce   : > { %v720_v36 = vpop.f32.mrf.mxu1 }
 0x1cf   : > { %v721_v38 = vadd.f32 %v958_v30, %v720_v36  ;;  %v732_v40 = vmul.f32 %v728_v35, %v728_v35 }
 0x1d0   : > { %v1032_v39 = vpop.f32.mrf.mxu1 }
 0x1d1   : > { %725 = vst [vmem:[%s486_s28 + $0x8] sm:$0xff] %v721_v38  ;;  %v729_v41 = vsub.f32 %v721_v38, %v727_v37  ;;  %v734_v45 = vmul.f32 %v732_v40, %v730_v42 }
 0x1d3   : > { %v733_v44 = vmul.f32 %v729_v41, %v729_v41 }
 0x1d5   : > { %v735_v46 = vmul.f32 %v733_v44, %v731_v43 }
 0x1d7   : > { %v736_v47 = vadd.f32 %v735_v46, %v734_v45 }
 0x1d9   : > { %737 = vadd.xlane.f32.xlu0 %v736_v47 }
 0x1dd   : > { %750 = vadd.xlane.f32.xlu0 %v749_v48 }
 0x262   : > { %v738_v49 = vpop.xlane.xlu0 %737 }
 0x263   : > { %v739_v50 = vrot.slane %v738_v49, 4 }
 0x265   : > { %v740_v51 = vadd.f32 %v739_v50, %v738_v49 }
 0x266   : > { %v751_v52 = vpop.xlane.xlu0 %750 }
 0x267   : > { %v741_v53 = vrot.slane %v740_v51, 2  ;;  %v752_v54 = vrot.slane %v751_v52, 4 }
 0x269   : > { %v753_v55 = vadd.f32 %v752_v54, %v751_v52  ;;  %v742_v56 = vadd.f32 %v741_v53, %v740_v51 }
 0x26b   : > { %v754_v57 = vrot.slane %v753_v55, 2  ;;  %v743_v58 = vrot.slane %v742_v56, 1 }
 0x26d   : > { %v755_v59 = vadd.f32 %v754_v57, %v753_v55  ;;  %v744_v60 = vadd.f32 %v743_v58, %v742_v56 }
 0x26f   : > { %1033 = vpush %v744_v60  ;;  %v756_v61 = vrot.slane %v755_v59, 1 }
 0x271   : > { %v757_v62 = vadd.f32 %v756_v61, %v755_v59 }
 0x273   : > { %1035 = vpush %v757_v62 }
 0x2a0   : > { %s1034_s15 = spop %1033 }
 0x2a1   : > { %v746_v63 = vstv %s1034_s15 }
 0x2a2   : > { %748 = vst.msk [vmem:[%s489_s14] sm:$0x1] %vm747_vm1, %v746_v63 }
 0x2a4   : > { %s1036_s20 = spop %1035 }
 0x2a5   : > { %v759_v0 = vstv %s1036_s20 }
 0x2a6   : > { %760 = vst.msk [vmem:[%s492_s19] sm:$0x1] %vm747_vm1, %v759_v0 }
 0x2a7 PF: > { %s27_s18 = sadd.s32 1, %s1084_s18  }
 0x2a8   : > { %p24_p13 = scmp.ge.s32.totalorder %s27_s18, 4  }
 0x2aa   :  { %26 = sbr.rel (!%p24_p13) target bundleno = 16 (0x10), region = 120 }

// kernel: flowmatching_action_head_forward.4
= control target key start
LH: loop header
LB: loop body
LE: loop exit
PB: predicated region body
PF: predicated region fallthrough
CT: control target
= control target key end

     0   :  { %s2189_s0 = inlined_call_operand.vmem [shape: s32[2], index: 0, kind: input, shape index: {}]   ;;  %s2190_s1 = inlined_call_operand.vmem [shape: f32[2,1,64], index: 1, kind: input, shape index: {}]   ;;  %s2191_s2 = inlined_call_operand.vmem [shape: f32[2,16,32], index: 2, kind: input, shape index: {}]   ;;  %s2192_s3 = inlined_call_operand.vmem [shape: f32[2,1,128], index: 3, kind: input, shape index: {}]   ;;  %s2193_s4 = inlined_call_operand.vmem [shape: bf16[4,64,128], index: 4, kind: input, shape index: {}]   ;;  %s2194_s5 = inlined_call_operand.vmem [shape: f32[4,1,128], index: 5, kind: input, shape index: {}]   ;;  %s2195_s6 = inlined_call_operand.vmem [shape: bf16[4,128,128], index: 6, kind: input, shape index: {}]   ;;  %s2196_s7 = inlined_call_operand.vmem [shape: f32[4,1,128], index: 7, kind: input, shape index: {}]   ;;  %s2197_s8 = inlined_call_operand.vmem [shape: bf16[4,32,128], index: 8, kind: input, shape index: {}]   ;;  %s2198_s9 = inlined_call_operand.vmem [shape: f32[4,1,128], index: 9, kind: input, shape index: {}]   ;;  %s2199_s10 = inlined_call_operand.vmem [shape: bf16[4,128,128], index: 10, kind: input, shape index: {}]   ;;  %s2200_s11 = inlined_call_operand.vmem [shape: bf16[4,128,128], index: 11, kind: input, shape index: {}]   ;;  %s2201_s12 = inlined_call_operand.vmem [shape: f32[4,1,128], index: 12, kind: input, shape index: {}]   ;;  %s2202_s13 = inlined_call_operand.vmem [shape: bf16[4,128,128], index: 13, kind: input, shape index: {}]   ;;  %s2203_s14 = inlined_call_operand.vmem [shape: f32[4,1,128], index: 14, kind: input, shape index: {}]   ;;  %s2204_s15 = inlined_call_operand.vmem [shape: f32[16,128], index: 15, kind: input, shape index: {}]   ;;  %s2205_s16 = inlined_call_operand.vmem [shape: f32[4,128], index: 16, kind: input, shape index: {}]   ;;  %s2206_s17 = inlined_call_operand.vmem [shape: f32[2,21,128], index: 17, kind: output, shape index: {}]  }
   0x1   :  { %2209 = sst [smem:[#allocation6_spill]] %s2189_s0 }
   0x2   :  { %2210 = sst [smem:[#allocation7_spill]] %s2190_s1 }
   0x3   :  { %2211 = sst [smem:[#allocation8_spill]] %s2196_s7 }
   0x4   :  { %2212 = sst [smem:[#allocation9_spill]] %s2204_s15 }
   0x5   :  { %s2213_s26 = sld [smem:[#allocation6_spill]] }
   0xb   :  { %s22_s7 = sshll.u32 %s2213_s26, 4  ;;  %s23_s7 = int_to_ptr.vmem [resolvable:$true] %s22_s7 }
   0xc   :  { %s1909_s27 = scalar_lea.vmem %s23_s7, 16  ;;  %p1914_p1 = scmp.lt.s32.totalorder %s23_s7, %s23_s7 }
   0xd   :  { %p1910_p0 = scmp.ne.s32.totalorder %s23_s7, %s1909_s27  ;;  %p1915_p2 = scmp.lt.s32.totalorder %s1909_s27, %s1909_s27 }
   0xf   :  { %p1916_p3 = por %p1915_p2, %p1914_p1 }
  0x11   :  { %p1917_p4 = pnand %p1916_p3, %p1910_p0 }
  0x13   :  { %1920 = shalt.err (!%p1917_p4)  }
  0x14   :  { %s1931_s28 = smov [#allocation3]  }
  0x15   :  { %25 = dma.vmem_to_smem %s23_s7, 16, %s1931_s28, [#allocation2] }
  0x16   :  { %1925 = dma.done.wait [#allocation2], 16 }
  0x17   :  { %1926 = vsyncadd [#allocation2], 4294967280 }
  0x18   :  { %27 = sfence }
  0x19   :  { %s2027_s29 = smov 0  }
  0x1a LB: > { %2214 = sst [smem:[#allocation5_spill]] %s1929_s29  ;;  %s2033_s0 = sadd.s32 4294967295, %s1929_s29   ;;  %s1929_s29 = sphi %s2027_s29, %s33_s29  }
  0x1b   : > { %p1637_p5 = scmp.ge.s32.totalorder %s1929_s29, 1  ;;  %p629_p6 = scmp.lt.s32.totalorder %s1929_s29, 3 }
  0x1d   : > { %p630_p7 = pnand %p1637_p5, %p629_p6 }
  0x1e   : > { %s752_s7 = sld [smem:[#allocation3 + %s2033_s0]] (!%p630_p7)  ;;  %p741_p8 = scmp.lt.s32.totalorder (!%p630_p7), %s2033_s0, 1 }
  0x1f   : > { %633 = sbr.rel (%p630_p7) target bundleno = 728 (0x2d8), region = 84  ;;  %s776_s30 = sld [smem:[#allocation3 + %s2033_s0]] (!%p630_p7) }
  0x20   : > { %s764_s18 = sld [smem:[#allocation3 + %s2033_s0]] (!%p630_p7) }
  0x21   : > { %s2215_s29 = sld [smem:[#allocation7_spill]] (!%p630_p7) }
  0x22   : > { %s2216_s26 = sld [smem:[#allocation8_spill]] (!%p630_p7) }
  0x24   : > { %v1932_v0 = vmov 0.0   ;;  %vm1933_vm0 = vmmov 0   ;;  %s2048_s19 = scalar_select %p741_p8, %s2033_s0, 1  ;;  %vm1037_vm1 = vcmask 261120   ;;  %vm860_vm2 = vcmask 523264  }
  0x25   : > { %1751 = vmatprep.subr.bf16.mxu1 %v1932_v0  ;;  %1759 = vmatprep.mubr.msk.bf16.mxu1 %vm1933_vm0, %v1932_v0  ;;  %p753_p9 = scmp.lt.s32.totalorder %s752_s7, 3  ;;  %p777_p10 = scmp.lt.s32.totalorder %s776_s30, 3  ;;  %v1439_v54 = vld [vmem:[%s2205_s16] sm:$0xf] }
  0x26   : > { %1783 = vmatprep.subr.bf16.mxu0 %v1932_v0  ;;  %1787 = vmatprep.mubr.msk.bf16.mxu0 %vm1933_vm0, %v1932_v0  ;;  %s1700_s1 = sshll.u32 %s2048_s19, 4  ;;  %p765_p11 = scmp.lt.s32.totalorder %s764_s18, 3 }
  0x27   : > { %s2220_s7 = smov (!%p753_p9, %s752_s7), 3  ;;  %s2222_s30 = smov (!%p777_p10, %s776_s30), 3 }
  0x28   : > { %s1701_s20 = sshll.u32 %s2220_s7, 5  ;;  %s1703_s24 = sshll.u32 %s2222_s30, 4 }
  0x29   : > { %s757_s23 = scalar_lea.vmem %s2193_s4, %s1701_s20  ;;  %s781_s27 = scalar_lea.vmem %s2197_s8, %s1703_s24 }
  0x2a   : > { %v1863_v1 = vld [vmem:[%s757_s23 + $0x18] sm:$0xff]   ;;  %s748_s15 = scalar_lea.vmem %s2191_s2, %s1700_s1  ;;  %s2224_s18 = smov (!%p765_p11, %s764_s18), 3  ;;  %v1864_v2 = vld [vmem:[%s757_s23 + $0x10] sm:$0xff]   ;;  %v1867_v3 = vld [vmem:[%s781_s27 + $0x8] sm:$0xff]  }
  0x2b   : > { %1752 = vmatpush3.bf16.msra.mxu1 %v1863_v1  ;;  %s1702_s7 = sshll.u32 %s2224_s18, 6  ;;  %v1011_v4 = vld [vmem:[%s748_s15] sm:$0xff]  ;;  %v1012_v5 = vld [vmem:[%s748_s15 + $0x8] sm:$0xff]  ;;  %s743_s1 = scalar_lea.vmem %s2215_s29, %s2048_s19  ;;  %1784 = vmatpush3.bf16.msra.mxu0 %v1867_v3 }
  0x2c   : > { %1753 = vmatprep.subr.bf16.mxu1 %v1932_v0  ;;  %v1865_v6 = vld [vmem:[%s757_s23 + $0x8] sm:$0xff]   ;;  %s2064_s21 = scalar_lea.vmem %s2195_s6, %s1702_s7  ;;  %v1868_v7 = vld [vmem:[%s781_s27] sm:$0xff]   ;;  %1785 = vmatprep.subr.bf16.mxu0 %v1932_v0  ;;  %v1017_v9 = vpack.c.bf16 %v1012_v5, %v1011_v4  ;;  %s795_s15 = sld [smem:[#allocation3 + %s2033_s0]] }
  0x2d   : > { %v825_v8 = vld [vmem:[%s743_s1] sm:$0x1]  ;;  %v1869_v12 = vld [vmem:[%s2064_s21 + $0x38] sm:$0xff]   ;;  %v1870_v13 = vld [vmem:[%s2064_s21 + $0x30] sm:$0xff]   ;;  %s788_s18 = sld [smem:[#allocation3 + %s2033_s0]]  ;;  %s751_s24 = scalar_lea.vmem %s2192_s3, %s2048_s19 }
  0x2e   : > { %v1866_v10 = vld [vmem:[%s757_s23] sm:$0xff]   ;;  %v834_v11 = vpack.c.bf16 %v825_v8, %v825_v8  ;;  %v1871_v14 = vld [vmem:[%s2064_s21 + $0x28] sm:$0xff]   ;;  %v1873_v16 = vld [vmem:[%s2064_s21 + $0x18] sm:$0xff]   ;;  %s759_s29 = sld [smem:[#allocation3 + %s2033_s0]] }
  0x2f   : > { %1754 = vmatpush3.bf16.msra.mxu1 %v1864_v2  ;;  %1786 = vmatpush3.bf16.msra.mxu0 %v1868_v7  ;;  %v1872_v15 = vld [vmem:[%s2064_s21 + $0x20] sm:$0xff]   ;;  %v1874_v17 = vld [vmem:[%s2064_s21 + $0x10] sm:$0xff]   ;;  %v1875_v18 = vld [vmem:[%s2064_s21 + $0x8] sm:$0xff]  }
  0x30   : > { %1755 = vmatprep.subr.bf16.mxu1 %v1932_v0  ;;  %1791 = vmatprep.subr.bf16.mxu0 %v1932_v0  ;;  %v1876_v19 = vld [vmem:[%s2064_s21] sm:$0xff]  }
  0x31   : > { %v1082_v28 = vld [vmem:[%s751_s24] sm:$0x1]  ;;  %s814_s24 = sld [smem:[#allocation3 + %s2033_s0]] }
  0x32   : > { %1788 = vmatmul.mubr.msk.bf16.vlgmr.msra.gmra.mxu0 %vm1037_vm1, %v1017_v9  ;;  %p796_p12 = scmp.lt.s32.totalorder %s795_s15, 3  ;;  %v1099_v29 = vpack.c.bf16 %v1082_v28, %v1082_v28 }
  0x33   : > { %1756 = vmatpush3.bf16.msra.mxu1 %v1865_v6  ;;  %1807 = vmatprep.mubr.msk.bf16.mxu0 %vm1933_vm0, %v1932_v0  ;;  %p789_p13 = scmp.lt.s32.totalorder %s788_s18, 3 }
  0x34   : > { %1757 = vmatprep.subr.bf16.mxu1 %v1932_v0  ;;  %s2226_s15 = smov (!%p796_p12, %s795_s15), 3  ;;  %p760_p0 = scmp.lt.s32.totalorder %s759_s29, 3 }
  0x35   : > { %s1705_s23 = sshll.u32 %s2226_s15, 6  ;;  %s2228_s18 = smov (!%p789_p13, %s788_s18), 3 }
  0x36   : > { %s800_s27 = scalar_lea.vmem %s2200_s11, %s1705_s23  ;;  %s1704_s28 = sshll.u32 %s2228_s18, 6 }
  0x37   : > { %1758 = vmatpush3.bf16.msra.mxu1 %v1866_v10  ;;  %v1877_v20 = vld [vmem:[%s800_s27 + $0x38] sm:$0xff]   ;;  %s2103_s20 = scalar_lea.vmem %s2199_s10, %s1704_s28  ;;  %v1878_v21 = vld [vmem:[%s800_s27 + $0x30] sm:$0xff]   ;;  %v1880_v22 = vld [vmem:[%s800_s27 + $0x28] sm:$0xff]   ;;  %s2230_s29 = smov (!%p760_p0, %s759_s29), 3  ;;  %v1205_v10 = vlaneseq }
  0x38   : > { %1763 = vmatprep.subr.bf16.mxu1 %v1932_v0  ;;  %1792 = vmatpush3.bf16.msra.mxu0 %v1877_v20  ;;  %v1882_v23 = vld [vmem:[%s800_s27 + $0x20] sm:$0xff]   ;;  %v1884_v24 = vld [vmem:[%s800_s27 + $0x18] sm:$0xff]   ;;  %v1886_v25 = vld [vmem:[%s800_s27 + $0x10] sm:$0xff]   ;;  %s762_s18 = scalar_lea.vmem %s2194_s5, %s2230_s29  ;;  %s783_s23 = sld [smem:[#allocation3 + %s2033_s0]] }
  0x39   : > { %1793 = vmatprep.subr.bf16.mxu0 %v1932_v0  ;;  %v1888_v26 = vld [vmem:[%s800_s27 + $0x8] sm:$0xff]   ;;  %v1890_v27 = vld [vmem:[%s800_s27] sm:$0xff]   ;;  %v1879_v40 = vld [vmem:[%s2103_s20 + $0x38] sm:$0xff]   ;;  %s1851_s28 = smul.u32 24, %s2048_s19  ;;  %p815_p5 = scmp.lt.s32.totalorder %s814_s24, 3 }
  0x3a   : > { %1760 = vmatmul.mubr.msk.bf16.vlgmr.msra.gmra.mxu1 %vm860_vm2, %v834_v11  ;;  %v835_v31 = vld [vmem:[%s762_s18] sm:$0x1]  ;;  %v1881_v43 = vld [vmem:[%s2103_s20 + $0x30] sm:$0xff]   ;;  %v1883_v44 = vld [vmem:[%s2103_s20 + $0x28] sm:$0xff]   ;;  %s771_s18 = sld [smem:[#allocation3 + %s2033_s0]]  ;;  %v1206_v11 = vshrl.u32 %v1205_v10, 7 }
  0x3b   : > { %1764 = vmatpush3.bf16.msra.mxu1 %v1869_v12  ;;  %1779 = vmatprep.mubr.msk.bf16.mxu1 %vm1933_vm0, %v1932_v0  ;;  %v1885_v45 = vld [vmem:[%s2103_s20 + $0x20] sm:$0xff]   ;;  %v1887_v46 = vld [vmem:[%s2103_s20 + $0x18] sm:$0xff]   ;;  %v1889_v47 = vld [vmem:[%s2103_s20 + $0x10] sm:$0xff]   ;;  %s2148_s21 = scalar_lea.vmem %s2206_s17, %s1851_s28  ;;  %s802_s28 = sld [smem:[#allocation3 + %s2033_s0]] }
  0x3c   : > { %1765 = vmatprep.subr.bf16.mxu1 %v1932_v0  ;;  %1794 = vmatpush3.bf16.msra.mxu0 %v1878_v21  ;;  %v1891_v48 = vld [vmem:[%s2103_s20 + $0x8] sm:$0xff]   ;;  %v1892_v50 = vld [vmem:[%s2103_s20] sm:$0xff]   ;;  %1440 = vst [vmem:[%s2148_s21 + $0x1] sm:$0xf] %v1439_v54  ;;  %s807_s20 = sld [smem:[#allocation3 + %s2033_s0]]  ;;  %s2240_s24 = smov (!%p815_p5, %s814_s24), 3 }
  0x3d   : > { %1795 = vmatprep.subr.bf16.mxu0 %v1932_v0  ;;  %s817_s19 = scalar_lea.vmem %s2203_s14, %s2240_s24 }
  0x3e   : > { %p784_p1 = scmp.lt.s32.totalorder %s783_s23, 3 }
  0x3f   : > { %1766 = vmatpush3.bf16.msra.mxu1 %v1870_v13 }
  0x40   : > { %1767 = vmatprep.subr.bf16.mxu1 %v1932_v0  ;;  %1796 = vmatpush3.bf16.msra.mxu0 %v1880_v22  ;;  %s2232_s23 = smov (!%p784_p1, %s783_s23), 3  ;;  %p772_p3 = scmp.lt.s32.totalorder %s771_s18, 3 }
  0x41   : > { %1797 = vmatprep.subr.bf16.mxu0 %v1932_v0  ;;  %s786_s27 = scalar_lea.vmem %s2198_s9, %s2232_s23  ;;  %p803_p4 = scmp.lt.s32.totalorder %s802_s28, 3 }
  0x42   : > { %v1666_v49 = vld [vmem:[%s786_s27] ss:$0 sm:$0xff]  ;;  %p808_p2 = scmp.lt.s32.totalorder %s807_s20, 3  ;;  %s2236_s18 = smov (!%p772_p3, %s771_s18), 3 }
  0x43   : > { %1768 = vmatpush3.bf16.msra.mxu1 %v1871_v14  ;;  %s774_s27 = scalar_lea.vmem %s2216_s26, %s2236_s18  ;;  %s2238_s28 = smov (!%p803_p4, %s802_s28), 3 }
  0x44   : > { %1769 = vmatprep.subr.bf16.mxu1 %v1932_v0  ;;  %1798 = vmatpush3.bf16.msra.mxu0 %v1882_v23  ;;  %s2234_s20 = smov (!%p808_p2, %s807_s20), 3  ;;  %v922_v4 = vld [vmem:[%s774_s27] sm:$0x1]  ;;  %s805_s22 = scalar_lea.vmem %s2201_s12, %s2238_s28 }
  0x45   : > { %1799 = vmatprep.subr.bf16.mxu0 %v1932_v0  ;;  %s1706_s29 = sshll.u32 %s2234_s20, 6  ;;  %v1686_v14 = vld [vmem:[%s805_s22] ss:$0 sm:$0xff]  ;;  %s2217_s18 = sld [smem:[#allocation9_spill]] }
  0x46   : > { %s812_s15 = scalar_lea.vmem %s2202_s13, %s1706_s29 }
  0x47   : > { %1770 = vmatpush3.bf16.msra.mxu1 %v1872_v15  ;;  %v1893_v59 = vld [vmem:[%s812_s15 + $0x38] sm:$0xff]   ;;  %v1894_v60 = vld [vmem:[%s812_s15 + $0x30] sm:$0xff]   ;;  %v1895_v61 = vld [vmem:[%s812_s15 + $0x28] sm:$0xff]  }
  0x48   : > { %1771 = vmatprep.subr.bf16.mxu1 %v1932_v0  ;;  %1800 = vmatpush3.bf16.msra.mxu0 %v1884_v24  ;;  %v1896_v62 = vld [vmem:[%s812_s15 + $0x20] sm:$0xff]   ;;  %v1897_v63 = vld [vmem:[%s812_s15 + $0x18] sm:$0xff]   ;;  %v1898_v1 = vld [vmem:[%s812_s15 + $0x10] sm:$0xff]  }
  0x49   : > { %1801 = vmatprep.subr.bf16.mxu0 %v1932_v0  ;;  %v1899_v2 = vld [vmem:[%s812_s15 + $0x8] sm:$0xff]   ;;  %v1900_v3 = vld [vmem:[%s812_s15] sm:$0xff]  }
  0x4b   : > { %1772 = vmatpush3.bf16.msra.mxu1 %v1873_v16 }
  0x4c   : > { %1773 = vmatprep.subr.bf16.mxu1 %v1932_v0  ;;  %1802 = vmatpush3.bf16.msra.mxu0 %v1886_v25 }
  0x4d   : > { %1803 = vmatprep.subr.bf16.mxu0 %v1932_v0 }
  0x4f   : > { %1774 = vmatpush3.bf16.msra.mxu1 %v1874_v17 }
  0x50   : > { %1775 = vmatprep.subr.bf16.mxu1 %v1932_v0  ;;  %1804 = vmatpush3.bf16.msra.mxu0 %v1888_v26 }
  0x51   : > { %1805 = vmatprep.subr.bf16.mxu0 %v1932_v0 }
  0x53   : > { %1776 = vmatpush3.bf16.msra.mxu1 %v1875_v18 }
  0x54   : > { %1777 = vmatprep.subr.bf16.mxu1 %v1932_v0  ;;  %1806 = vmatpush3.bf16.msra.mxu0 %v1890_v27 }
  0x55   : > { %1831 = vmatprep.subr.bf16.mxu0 %v1932_v0 }
  0x57   : > { %1778 = vmatpush3.bf16.msra.mxu1 %v1876_v19  ;;  %1808 = vmatmul.mubr.bf16.vlgmr.msra.gmra.mxu0 %v1099_v29 }
  0x58   : > { %1811 = vmatprep.subr.bf16.mxu1 %v1932_v0  ;;  %1847 = vmatprep.mubr.msk.bf16.mxu0 %vm1933_vm0, %v1932_v0 }
  0x59   : > { %1832 = vmatpush3.bf16.msra.mxu0 %v1893_v59 }
  0x5a   : > { %1833 = vmatprep.subr.bf16.mxu0 %v1932_v0 }
  0x5d   : > { %1834 = vmatpush3.bf16.msra.mxu0 %v1894_v60 }
  0x5e   : > { %1835 = vmatprep.subr.bf16.mxu0 %v1932_v0 }
  0x61   : > { %1836 = vmatpush3.bf16.msra.mxu0 %v1895_v61 }
  0x62   : > { %1837 = vmatprep.subr.bf16.mxu0 %v1932_v0 }
  0x65   : > { %1838 = vmatpush3.bf16.msra.mxu0 %v1896_v62 }
  0x66   : > { %1839 = vmatprep.subr.bf16.mxu0 %v1932_v0 }
  0x69   : > { %1840 = vmatpush3.bf16.msra.mxu0 %v1897_v63 }
  0x6a   : > { %1841 = vmatprep.subr.bf16.mxu0 %v1932_v0 }
  0x6d   : > { %1842 = vmatpush3.bf16.msra.mxu0 %v1898_v1 }
  0x6e   : > { %1843 = vmatprep.subr.bf16.mxu0 %v1932_v0 }
  0x71   : > { %1844 = vmatpush3.bf16.msra.mxu0 %v1899_v2 }
  0x72   : > { %1845 = vmatprep.subr.bf16.mxu0 %v1932_v0 }
  0x75   : > { %1846 = vmatpush3.bf16.msra.mxu0 %v1900_v3 }
  0xf2   : > { %v1075_v30 = vpop.f32.mrf.mxu0 }
  0xf3   : > { %v1076_v51 = vadd.f32 %v1666_v49, %v1075_v30 }
  0xf4   : > { %v1789_v32 = vpop.f32.mrf.mxu0 }
  0xf6   : > { %v1078_v34 = vpop.f32.mrf.mxu0 }
  0xf7   : > { %v1079_v52 = vadd.f32 %v1666_v49, %v1078_v34 }
  0xf8   : > { %v1790_v37 = vpop.f32.mrf.mxu0 }
  0xf9   : > { %v1204_v53 = vpack.c.bf16 %v1079_v52, %v1076_v51 }
  0xfa   : > { %v898_v33 = vpop.f32.mrf.mxu1 }
  0xfb   : > { %v899_v35 = vadd.f32 %v898_v33, %v835_v31  ;;  %v1689_v33 = vld [vmem:[%s817_s19] ss:$0 sm:$0xff] }
  0xfc   : > { %v1761_v36 = vpop.f32.mrf.mxu1 }
  0xfd   : > { %v904_v38 = vmax.f32 %v899_v35, 0.0  ;;  %v1434_v35 = vld [vmem:[%s2217_s18] sm:$0xff] }
  0xfe   : > { %v901_v39 = vpop.f32.mrf.mxu1 }
  0xff   : > { %v921_v41 = vpack.c.bf16 %v904_v38, %v904_v38 }
 0x100   : > { %v1762_v42 = vpop.f32.mrf.mxu1 }
 0x101   : > { %1780 = vmatmul.mubr.bf16.vlgmr.msra.gmra.mxu1 %v921_v41 }
 0x102   : > { %1812 = vmatpush3.bf16.msra.mxu1 %v1879_v40  ;;  %1827 = vmatprep.mubr.msk.bf16.mxu1 %vm1933_vm0, %v1932_v0  ;;  %v1435_v40 = vld [vmem:[%s2217_s18 + $0x8] sm:$0xff] }
 0x103   : > { %1813 = vmatprep.subr.bf16.mxu1 %v1932_v0 }
 0x106   : > { %1814 = vmatpush3.bf16.msra.mxu1 %v1881_v43 }
 0x107   : > { %1815 = vmatprep.subr.bf16.mxu1 %v1932_v0 }
 0x10a   : > { %1816 = vmatpush3.bf16.msra.mxu1 %v1883_v44 }
 0x10b   : > { %1817 = vmatprep.subr.bf16.mxu1 %v1932_v0 }
 0x10e   : > { %1818 = vmatpush3.bf16.msra.mxu1 %v1885_v45 }
 0x10f   : > { %1819 = vmatprep.subr.bf16.mxu1 %v1932_v0 }
 0x112   : > { %1820 = vmatpush3.bf16.msra.mxu1 %v1887_v46 }
 0x113   : > { %1821 = vmatprep.subr.bf16.mxu1 %v1932_v0 }
 0x116   : > { %1822 = vmatpush3.bf16.msra.mxu1 %v1889_v47 }
 0x117   : > { %1823 = vmatprep.subr.bf16.mxu1 %v1932_v0  ;;  %v1182_v55 = vpop.f32.mrf.mxu0 }
 0x119   : > { %v1809_v56 = vpop.f32.mrf.mxu0 }
 0x11a   : > { %1824 = vmatpush3.bf16.msra.mxu1 %v1891_v48 }
 0x11b   : > { %1825 = vmatprep.subr.bf16.mxu1 %v1932_v0  ;;  %v1185_v57 = vpop.f32.mrf.mxu0  ;;  %v1207_v0 = vsub.s32 0, %v1206_v11 }
 0x11d   : > { %v1810_v58 = vpop.f32.mrf.mxu0  ;;  %v1208_v12 = vrot.slane %v1182_v55, %v1207_v0 }
 0x11e   : > { %1826 = vmatpush3.bf16.msra.mxu1 %v1892_v50 }
 0x121   : > { %1828 = vmatmul.mubr.bf16.vlgmr.msra.gmra.mxu1 %v1204_v53 }
 0x1c1   : > { %v1005_v5 = vpop.f32.mrf.mxu1 }
 0x1c2   : > { %v1006_v6 = vadd.f32 %v1005_v5, %v922_v4 }
 0x1c3   : > { %v1781_v7 = vpop.f32.mrf.mxu1 }
 0x1c4   : > { %1438 = vst [vmem:[%s2148_s21] sm:$0x1] %v1006_v6 }
 0x1c5   : > { %v1008_v8 = vpop.f32.mrf.mxu1 }
 0x1c7   : > { %v1782_v9 = vpop.f32.mrf.mxu1 }
 0x1e1   : > { %v1291_v13 = vpop.f32.mrf.mxu1 }
 0x1e2   : > { %v1292_v15 = vadd.f32 %v1291_v13, %v1208_v12 }
 0x1e3   : > { %v1829_v16 = vpop.f32.mrf.mxu1 }
 0x1e4   : > { %v1305_v17 = vadd.f32 %v1686_v14, %v1292_v15 }
 0x1e5   : > { %v1294_v18 = vpop.f32.mrf.mxu1 }
 0x1e6   : > { %v1687_v19 = vmul.f32 -1.442695, %v1305_v17  ;;  %v1295_v20 = vadd.f32 %v1294_v18, %v1208_v12 }
 0x1e7   : > { %v1830_v21 = vpop.f32.mrf.mxu1 }
 0x1e8   : > { %1901 = vpow2.f32 %v1687_v19  ;;  %v1306_v22 = vadd.f32 %v1686_v14, %v1295_v20 }
 0x1ea   : > { %v1688_v23 = vmul.f32 -1.442695, %v1306_v22 }
 0x1ec   : > { %1903 = vpow2.f32 %v1688_v23 }
 0x1f5   : > { %v1902_v24 = vpop.eup %1901 }
 0x1f6   : > { %v1313_v25 = vadd.f32 1.0, %v1902_v24 }
 0x1f8   : > { %1905 = vrcp.f32 %v1313_v25 }
 0x1f9   : > { %v1904_v26 = vpop.eup %1903 }
 0x1fa   : > { %v1314_v27 = vadd.f32 1.0, %v1904_v26 }
 0x1fc   : > { %1907 = vrcp.f32 %v1314_v27 }
 0x205   : > { %v1906_v28 = vpop.eup %1905 }
 0x206   : > { %v1319_v30 = vmul.f32 %v1906_v28, %v1305_v17 }
 0x209   : > { %v1908_v29 = vpop.eup %1907 }
 0x20a   : > { %v1320_v31 = vmul.f32 %v1908_v29, %v1306_v22 }
 0x20c   : > { %v1337_v32 = vpack.c.bf16 %v1320_v31, %v1319_v30 }
 0x20e   : > { %1848 = vmatmul.mubr.bf16.vlgmr.msra.gmra.mxu0 %v1337_v32 }
 0x2ce   : > { %v1427_v34 = vpop.f32.mrf.mxu0 }
 0x2cf   : > { %v1428_v36 = vadd.f32 %v1689_v33, %v1427_v34 }
 0x2d0   : > { %v1849_v37 = vpop.f32.mrf.mxu0 }
 0x2d1   : > { %v1436_v38 = vadd.f32 %v1434_v35, %v1428_v36 }
 0x2d2   : > { %v1430_v39 = vpop.f32.mrf.mxu0 }
 0x2d3   : > { %1441 = vst [vmem:[%s2148_s21 + $0x5] sm:$0xff] %v1436_v38  ;;  %v1431_v41 = vadd.f32 %v1689_v33, %v1430_v39 }
 0x2d4   : > { %v1850_v42 = vpop.f32.mrf.mxu0 }
 0x2d5   : > { %v1437_v43 = vadd.f32 %v1435_v40, %v1431_v41 }
 0x2d7   : > { %1442 = vst [vmem:[%s2148_s21 + $0xd] sm:$0xff] %v1437_v43 }
 0x2d8 PF: > { %s2218_s0 = sld [smem:[#allocation5_spill]] }
 0x2de   : > { %s33_s29 = sadd.s32 1, %s2218_s0  }
 0x2df   : > { %p30_p6 = scmp.ge.s32.totalorder %s33_s29, 4  }
 0x2e1   :  { %32 = sbr.rel (!%p30_p6) target bundleno = 26 (0x1a), region = 153 }

</bundles_post_ra>
